<compile_context>
chip_gen: v7x
topology: tpu7x:2x2x1
jax: 0.10.0
libtpu: 0.0.40
codegen_flags: <defaults>
</compile_context>

<pallas_src>
import functools

import numpy as np
import jax
import jax.numpy as jnp
from jax import lax
from jax.experimental import pallas as pl
from jax.experimental.pallas import tpu as pltpu


def _round_up(v, m):
    return (v + m - 1) // m * m


# Contract last dim of x [tm, tk] with last dim of w [tn, tk]  ->  [tm, tn].
_NT_DIMS = (((1,), (1,)), ((), ()))


def _epilogue(acc, b_ref, o_ref, *, weight_gain, bias_gain, activation):
    # Scalar equalized-lr gain applied to the f32 accumulator (O(M*N) work,
    # not O(N*K) on the weight).
    acc = acc * jnp.float32(weight_gain)
    b = b_ref[...].astype(jnp.float32)          # (1, tn) broadcasts on sublanes
    if bias_gain != 1:
        b = b * jnp.float32(bias_gain)
    acc = acc + b
    if activation == "linear":
        pass
    elif activation == "lrelu":
        s = float(np.sqrt(2.0))
        # Fused select+mul: one multiply per element.
        acc = acc * jnp.where(acc >= 0, jnp.float32(s), jnp.float32(0.2 * s))
    elif activation == "relu":
        s = float(np.sqrt(2.0))
        acc = acc * jnp.where(acc >= 0, jnp.float32(s), jnp.float32(0.0))
    else:
        # TODO(synk): other bias_act activations (sigmoid/tanh/swish/elu/...) not wired up.
        raise NotImplementedError(activation)
    o_ref[...] = acc.astype(o_ref.dtype)


def _fc_kernel_single(x_ref, w_ref, b_ref, o_ref, *,
                      weight_gain, bias_gain, activation, compute_dtype):
    # Single reduction step: no scratch accumulator, no pl.when branches.
    x = x_ref[...].astype(compute_dtype)
    w = w_ref[...].astype(compute_dtype)
    acc = lax.dot_general(x, w, _NT_DIMS, preferred_element_type=jnp.float32)
    _epilogue(acc, b_ref, o_ref, weight_gain=weight_gain,
              bias_gain=bias_gain, activation=activation)


def _fc_kernel_multi(x_ref, w_ref, b_ref, o_ref, acc_ref, *,
                     weight_gain, bias_gain, activation, compute_dtype,
                     tk, k_rem):
    k = pl.program_id(2)
    nk = pl.num_programs(2)

    x = x_ref[...]
    w = w_ref[...]
    if k_rem:
        # K does not divide tk: zero BOTH operands' out-of-bounds lanes on the
        # (partial) last reduction step so OOB garbage (possibly NaN/Inf) can
        # never leak into valid accumulator entries.
        lim = jnp.where(k == nk - 1, k_rem, tk)
        lane = lax.broadcasted_iota(jnp.int32, (1, tk), 1)
        keep = lane < lim
        x = jnp.where(keep, x, 0)
        w = jnp.where(keep, w, 0)
    x = x.astype(compute_dtype)
    w = w.astype(compute_dtype)
    p = lax.dot_general(x, w, _NT_DIMS, preferred_element_type=jnp.float32)

    @pl.when(k == 0)
    def _init():
        acc_ref[...] = p            # direct write: no zero-init + RMW on step 0

    @pl.when(k != 0)
    def _accum():
        acc_ref[...] += p

    @pl.when(k == nk - 1)
    def _finalize():
        _epilogue(acc_ref[...], b_ref, o_ref, weight_gain=weight_gain,
                  bias_gain=bias_gain, activation=activation)


def _xla_forward(x, weight, bias, *, weight_gain, bias_gain, activation):
    """Fused XLA path for tiny problems where pallas_call overhead dominates."""
    w = weight.astype(x.dtype)
    y = jnp.dot(x, w.T, preferred_element_type=jnp.float32) * jnp.float32(weight_gain)
    if bias is not None:
        y = y + bias.astype(jnp.float32) * jnp.float32(bias_gain)
    if activation == "lrelu":
        y = jnp.where(y >= 0, y, 0.2 * y) * np.float32(np.sqrt(2.0))
    elif activation == "relu":
        y = jnp.maximum(y, 0.0) * np.float32(np.sqrt(2.0))
    return y.astype(x.dtype)


def fully_connected_layer(x, weight, bias=None, *, lr_multiplier=1.0,
                          activation="linear", tm=256, tn=512, tk=2048,
                          mxu_dtype=None, weight_buffers=2, use_pallas=None):
    """Pallas TPU FullyConnectedLayer.forward.

    x:      [M, in_features]
    weight: [out_features, in_features]   (native PyTorch layout, no transpose)
    bias:   [out_features] or None
    mxu_dtype: e.g. jnp.bfloat16 to cast MXU operands in-kernel (v6e/v7x fast
               path); None keeps x's dtype.  f32 accumulation either way.
    weight_buffers: pipeline depth for the weight tile stream (>2 uses
               pl.Buffered; worth sweeping for small-batch shapes).
    use_pallas: True/False to force, None for a size-based auto choice.
    """
    M, K = x.shape
    N, K2 = weight.shape
    assert K == K2, (K, K2)
    if activation not in ("linear", "lrelu", "relu"):
        # TODO(synk): other bias_act activations (sigmoid/tanh/swish/elu/...) not wired up.
        raise NotImplementedError(activation)

    weight_gain = float(lr_multiplier) / float(np.sqrt(K))
    bias_gain = float(lr_multiplier)

    if use_pallas is None:
        # Tiny problems: XLA's fused dot wins (pallas_call / DMA setup dominates).
        use_pallas = (weight.size * weight.dtype.itemsize >= (1 << 20)
                      or M * N * K >= (1 << 24))
    if not use_pallas:
        return _xla_forward(x, weight, bias, weight_gain=weight_gain,
                            bias_gain=bias_gain, activation=activation)

    compute_dtype = jnp.dtype(mxu_dtype) if mxu_dtype is not None else x.dtype

    if bias is None:
        b2 = jnp.zeros((1, N), jnp.float32)
    else:
        b2 = bias.reshape(1, N)

    # ---- tile selection ---------------------------------------------------
    tm = max(8, (min(tm, _round_up(M, 8)) // 8) * 8)
    tn = max(128, (min(tn, _round_up(N, 128)) // 128) * 128)
    if K <= tk:
        tk_eff = K                       # single reduction step, full-K block
    else:
        tk_eff = max(128, (min(tk, K) // 128) * 128)
    k_steps = pl.cdiv(K, tk_eff)
    k_rem = K % tk_eff

    # Give v7x's two TensorCores at least two "parallel" output blocks.
    if pl.cdiv(M, tm) * pl.cdiv(N, tn) == 1:
        if N > 128:
            tn = _round_up(pl.cdiv(N, 2), 128)
        elif M > 8:
            tm = _round_up(pl.cdiv(M, 2), 8)
    gm, gn = pl.cdiv(M, tm), pl.cdiv(N, tn)

    # ---- VMEM budget ------------------------------------------------------
    wbuf = max(2, int(weight_buffers))
    vmem_needed = (2 * tm * tk_eff * x.dtype.itemsize
                   + wbuf * tn * tk_eff * weight.dtype.itemsize
                   + 2 * tn * b2.dtype.itemsize
                   + 2 * tm * tn * x.dtype.itemsize
                   + (tm * tn * 4 if k_steps > 1 else 0))
    vmem_limit = int(min(max(int(vmem_needed * 1.25) + (2 << 20), 16 << 20),
                         48 << 20))

    # ---- grid / specs / kernel --------------------------------------------
    if k_steps == 1:
        grid = (gm, gn)
        x_spec = pl.BlockSpec((tm, tk_eff), lambda i, j: (i, 0))
        w_spec_args = ((tn, tk_eff), lambda i, j: (j, 0))
        b_spec = pl.BlockSpec((1, tn), lambda i, j: (0, j))
        out_spec = pl.BlockSpec((tm, tn), lambda i, j: (i, j))
        scratch = []
        kernel = functools.partial(_fc_kernel_single, weight_gain=weight_gain,
                                   bias_gain=bias_gain, activation=activation,
                                   compute_dtype=compute_dtype)
        dims = ("parallel", "parallel")
    else:
        grid = (gm, gn, k_steps)
        x_spec = pl.BlockSpec((tm, tk_eff), lambda i, j, k: (i, k))
        w_spec_args = ((tn, tk_eff), lambda i, j, k: (j, k))
        b_spec = pl.BlockSpec((1, tn), lambda i, j, k: (0, j))
        out_spec = pl.BlockSpec((tm, tn), lambda i, j, k: (i, j))
        scratch = [pltpu.VMEM((tm, tn), jnp.float32)]
        kernel = functools.partial(_fc_kernel_multi, weight_gain=weight_gain,
                                   bias_gain=bias_gain, activation=activation,
                                   compute_dtype=compute_dtype,
                                   tk=tk_eff, k_rem=k_rem)
        # K must stay innermost & "arbitrary" (accumulator pattern).
        dims = ("parallel", "parallel", "arbitrary")

    if wbuf > 2:
        # Deeper buffering on the dominant (weight) DMA stream.
        w_spec = pl.BlockSpec(*w_spec_args, pipeline_mode=pl.Buffered(wbuf))
    else:
        w_spec = pl.BlockSpec(*w_spec_args)

    out = pl.pallas_call(
        kernel,
        out_shape=jax.ShapeDtypeStruct((M, N), x.dtype),
        grid_spec=pltpu.PrefetchScalarGridSpec(
            num_scalar_prefetch=0,
            grid=grid,
            in_specs=[x_spec, w_spec, b_spec],
            out_specs=out_spec,
            scratch_shapes=scratch,
        ),
        compiler_params=pltpu.CompilerParams(
            dimension_semantics=dims,
            vmem_limit_bytes=vmem_limit,
        ),
    )(x, weight, b2)
    return out


def _reference(x, weight, bias, *, lr_multiplier=1.0, activation="linear"):
    x = np.asarray(x, np.float32)
    w = np.asarray(weight, np.float32)
    b = np.asarray(bias, np.float32)
    wg = lr_multiplier / np.sqrt(x.shape[1])
    y = x @ (w * wg).T + (b * lr_multiplier)[None, :]
    if activation == "lrelu":
        y = np.where(y >= 0, y, 0.2 * y) * np.sqrt(2.0)
    elif activation == "relu":
        y = np.maximum(y, 0.0) * np.sqrt(2.0)
    return y


if __name__ == "__main__":
    key = jax.random.PRNGKey(0)
    k_x, k_w = jax.random.split(key, 2)

    # StyleGAN2 mapping-network style FC: 1024 -> 512, lrelu, lr_mult=0.01.
    # Module __init__: weight = randn/lr_mult, bias = full(bias_init).
    batch, in_features, out_features = 32, 1024, 512
    lr_multiplier, bias_init = 0.01, 100.0
    weight = jax.random.normal(k_w, (out_features, in_features), jnp.float32) / lr_multiplier
    bias = jnp.full((out_features,), np.float32(bias_init))
    x = jax.random.normal(k_x, (batch, in_features), jnp.float32)

    # 1) f32 path (single K step, tn split for two parallel blocks).
    y = jax.block_until_ready(
        fully_connected_layer(x, weight, bias, lr_multiplier=lr_multiplier,
                              activation="lrelu"))
    y_ref = _reference(x, weight, bias, lr_multiplier=lr_multiplier,
                       activation="lrelu")
    np.testing.assert_allclose(np.asarray(y), y_ref, rtol=1e-3, atol=1e-3)

    # 2) bf16-MXU fast path (v6e/v7x), f32 accumulation, looser tolerance.
    y_bf = jax.block_until_ready(
        fully_connected_layer(x, weight, bias, lr_multiplier=lr_multiplier,
                              activation="lrelu", mxu_dtype=jnp.bfloat16))
    np.testing.assert_allclose(np.asarray(y_bf), y_ref, rtol=5e-2, atol=5e-2)

    # 3) Tiny shape / partial edge-block path (linear, N < 128), forced Pallas.
    b2_, i2, o2 = 8, 32, 64
    w_s = jax.random.normal(jax.random.PRNGKey(1), (o2, i2), jnp.float32)
    b_s = jnp.full((o2,), np.float32(0.5))
    x_s = jax.random.normal(jax.random.PRNGKey(2), (b2_, i2), jnp.float32)
    y_s = jax.block_until_ready(
        fully_connected_layer(x_s, w_s, b_s, activation="linear", use_pallas=True))
    np.testing.assert_allclose(np.asarray(y_s), _reference(x_s, w_s, b_s),
                               rtol=1e-4, atol=1e-4)
    # Same tiny shape through the auto XLA fallback.
    y_a = jax.block_until_ready(fully_connected_layer(x_s, w_s, b_s, activation="linear"))
    np.testing.assert_allclose(np.asarray(y_a), _reference(x_s, w_s, b_s),
                               rtol=1e-4, atol=1e-4)

    # 4) Non-divisible K with multiple reduction steps (in-kernel K mask + acc).
    b3, i3, o3 = 16, 1000, 256
    w_k = jax.random.normal(jax.random.PRNGKey(3), (o3, i3), jnp.float32)
    b_k = jnp.zeros((o3,), jnp.float32)
    x_k = jax.random.normal(jax.random.PRNGKey(4), (b3, i3), jnp.float32)
    y_k = jax.block_until_ready(
        fully_connected_layer(x_k, w_k, b_k, activation="relu", tk=512,
                              use_pallas=True))
    np.testing.assert_allclose(np.asarray(y_k),
                               _reference(x_k, w_k, b_k, activation="relu"),
                               rtol=1e-3, atol=1e-3)

    print("KERNEL_OK")
</pallas_src>

<mosaic_0001>
module attributes {stable_mosaic.version = 11 : i64} {
  func.func @_fc_kernel_single(%arg0: i32, %arg1: i32, %arg2: memref<32x1024xf32, #tpu.memory_space<vmem>>, %arg3: memref<256x1024xf32, #tpu.memory_space<vmem>>, %arg4: memref<1x256xf32, #tpu.memory_space<vmem>>, %arg5: memref<32x256xf32, #tpu.memory_space<vmem>>) attributes {dimension_semantics = [#tpu.dimension_semantics<parallel>, #tpu.dimension_semantics<parallel>], iteration_bounds = array<i64: 1, 2>, scalar_prefetch = 0 : i64, scratch_operands = 0 : i64, tpu.core_type = #tpu.core_type<tc>, window_params = [{transform_indices = @transform_0, window_bounds = array<i64: 32, 1024>}, {transform_indices = @transform_1, window_bounds = array<i64: 256, 1024>}, {transform_indices = @transform_2, window_bounds = array<i64: 1, 256>}, {transform_indices = @transform_3, window_bounds = array<i64: 32, 256>}]} {
    %c0 = arith.constant 0 : index
    %c0_0 = arith.constant 0 : index
    %0 = vector.load %arg2[%c0, %c0_0] : memref<32x1024xf32, #tpu.memory_space<vmem>>, vector<32x1024xf32>
    %c0_1 = arith.constant 0 : index
    %c0_2 = arith.constant 0 : index
    %1 = vector.load %arg3[%c0_1, %c0_2] : memref<256x1024xf32, #tpu.memory_space<vmem>>, vector<256x1024xf32>
    %cst = arith.constant dense<0.000000e+00> : vector<32x256xf32>
    %2 = tpu.matmul %0, %1, %cst {dimension_numbers = #tpu.dot_dimension_numbers<[1], [1], [0], [0], [0, 0, 1, 0], [], []>} : vector<32x1024xf32>, vector<256x1024xf32>, vector<32x256xf32> -> vector<32x256xf32>
    %cst_3 = arith.constant 3.125000e-04 : f32
    %3 = vector.broadcast %cst_3 : f32 to vector<32x256xf32>
    %4 = arith.mulf %2, %3 : vector<32x256xf32>
    %c0_4 = arith.constant 0 : index
    %c0_5 = arith.constant 0 : index
    %5 = vector.load %arg4[%c0_4, %c0_5] : memref<1x256xf32, #tpu.memory_space<vmem>>, vector<1x256xf32>
    %cst_6 = arith.constant 0.00999999977 : f32
    %6 = vector.broadcast %cst_6 : f32 to vector<1x256xf32>
    %7 = arith.mulf %5, %6 : vector<1x256xf32>
    %8 = vector.broadcast %7 : vector<1x256xf32> to vector<32x256xf32>
    %9 = arith.addf %4, %8 : vector<32x256xf32>
    %cst_7 = arith.constant 0.000000e+00 : f32
    %10 = vector.broadcast %cst_7 : f32 to vector<32x256xf32>
    %11 = arith.cmpf oge, %9, %10 : vector<32x256xf32>
    %cst_8 = arith.constant 1.41421354 : f32
    %cst_9 = arith.constant 0.282842726 : f32
    %12 = vector.broadcast %cst_8 : f32 to vector<32x256xf32>
    %13 = vector.broadcast %cst_9 : f32 to vector<32x256xf32>
    %14 = arith.select %11, %12, %13 : vector<32x256xi1>, vector<32x256xf32>
    %15 = arith.mulf %9, %14 : vector<32x256xf32>
    %c0_10 = arith.constant 0 : index
    %c0_11 = arith.constant 0 : index
    %16 = vector.load %arg5[%c0_10, %c0_11] : memref<32x256xf32, #tpu.memory_space<vmem>>, vector<32x256xf32>
    tpu.vector_store %arg5[%c0_10, %c0_11], %15 {strides = array<i32>} : memref<32x256xf32, #tpu.memory_space<vmem>>, vector<32x256xf32>,
    return
  }
  func.func @transform_0(%arg0: i32, %arg1: i32) -> (i32, i32) {
    %c0_i32 = arith.constant 0 : i32
    %c0_i32_0 = arith.constant 0 : i32
    return %arg0, %c0_i32 : i32, i32
  }
  func.func @transform_1(%arg0: i32, %arg1: i32) -> (i32, i32) {
    %c0_i32 = arith.constant 0 : i32
    %c0_i32_0 = arith.constant 0 : i32
    return %arg1, %c0_i32 : i32, i32
  }
  func.func @transform_2(%arg0: i32, %arg1: i32) -> (i32, i32) {
    %c0_i32 = arith.constant 0 : i32
    %c0_i32_0 = arith.constant 0 : i32
    return %c0_i32, %arg1 : i32, i32
  }
  func.func @transform_3(%arg0: i32, %arg1: i32) -> (i32, i32) {
    %c0_i32 = arith.constant 0 : i32
    return %arg0, %arg1 : i32, i32
  }
}

</mosaic_0001>

<bundles_post_ra>
// kernel: tpu_custom_call.1
= control target key start
LH: loop header
LB: loop body
LE: loop exit
PB: predicated region body
PF: predicated region fallthrough
CT: control target
= control target key end

     0   :  { %s2237_s0 = inlined_call_operand.hbm [shape: f32[32,1024], index: 0, kind: input, shape index: {}]   ;;  %s2238_s1 = inlined_call_operand.hbm [shape: f32[512,1024], index: 1, kind: input, shape index: {}]   ;;  %s2239_s2 = inlined_call_operand.hbm [shape: f32[1,512], index: 2, kind: input, shape index: {}]   ;;  %s2240_s3 = inlined_call_operand.hbm [shape: f32[32,512], index: 3, kind: output, shape index: {}]  }
   0x1   :  { %2251 = sst [smem:[#allocation13_spill]] %s2238_s1 }
   0x2   :  { %8 = vsyncpa [#allocation3], 0 }
   0x3   :  { %9 = vsyncpa [#allocation6], 0 }
   0x4   :  { %11 = vsyncpa [#allocation6 + $0x1], 0 }
   0x5   :  { %12 = vsyncpa [#allocation4], 0 }
   0x6   :  { %14 = vsyncpa [#allocation4 + $0x1], 0  ;;  %s1704_s12 = smov 0   ;;  %s1706_s13 = smov 0  }
   0x7   :  { %s1708_s14 = smov 0   ;;  %s1710_s15 = smov 0  }
   0x8   :  { %s1712_s16 = smov 0   ;;  %s1714_s17 = smov 0  }
   0x9 LB: > { %s29_s18 = sadd.s32 1, %s1668_s16  ;;  %s65_s19 = sadd.s32 1, %s1660_s14  ;;  %s1672_s17 = sphi %s1714_s17, %s20_s17   ;;  %s1668_s16 = sphi %s1712_s16, %s2278_s16   ;;  %s1664_s15 = sphi %s1710_s15, %s2277_s15   ;;  %s1660_s14 = sphi %s1708_s14, %s2276_s14   ;;  %s1656_s13 = sphi %s1706_s13, %s2275_s13   ;;  %s1652_s12 = sphi %s1704_s12, %s2274_s12  }
   0xa   : > { %p30_p0 = scmp.ge.s32.totalorder %s29_s18, 2  ;;  %p72_p1 = scmp.ne.s32.totalorder %s1660_s14, %s1656_s13 }
   0xb   : > { %p73_p2 = scmp.eq.s32.totalorder %s1672_s17, 0  ;;  %p1440_p6 = scmp.lt.s32.totalorder %s1672_s17, 2 }
   0xc   : > { %s2280_s18 = smov (%p30_p0, %s29_s18), 0  ;;  %s173_s22 = sand.u32 1, %s1672_s17  }
   0xd   : > { %2252 = sst [smem:[#allocation12_spill]] %s2280_s18  ;;  %p1744_p3 = por %p73_p2, %p72_p1 }
   0xe   : > { %s62_s21 = ssub.s32 %s1668_s16, %s2280_s18  ;;  %s175_s23 = sand.u32 1, %s1660_s14  }
   0xf   : > { %p63_p5 = scmp.eq.s32.totalorder %s62_s21, 0  ;;  %s1113_s25 = sshll.u32 %s175_s23, 11 }
  0x10   : > { %s1131_s26 = sshll.u32 %s1668_s16, 15  ;;  %s2254_s1 = sld [smem:[#allocation13_spill]] }
  0x11   : > { %s1755_s24 = scalar_select %p63_p5, %s1660_s14, %s65_s19  }
  0x12   : > { %s177_s30 = scalar_lea.vmem [#allocation5], %s1113_s25  ;;  %p1769_p7 = pnand %p1440_p6, %p1744_p3 }
  0x13   : > { %s185_s4 = sshll.u32 %s177_s30, 4  ;;  %s1773_s6 = scalar_lea.sflag [#allocation6], %s173_s22  ;;  %s1765_s4 = int_to_ptr.vmem [resolvable:$true] %s185_s4 }
  0x14   : > { %s2255_s5 = scalar_select %p1769_p7, 1, 0 }
  0x15   : > { %p2245_p9 = pneg %p1769_p7 }
  0x16   : > { %s1763_s29 = scalar_lea.hbm %s2254_s1, %s1131_s26  ;;  %s1503_s10 = scalar_lea.hbm %s2254_s1, 65536 }
  0x17   : > { %s1498_s7 = scalar_lea.hbm %s1763_s29, 32768  ;;  %p1504_p12 = scmp.lt.u32.totalorder %s1763_s29, %s2254_s1 }
  0x18   : > { %p1499_p8 = scmp.ne.s32.totalorder %s1763_s29, %s1498_s7  ;;  %p1505_p13 = scmp.lt.u32.totalorder %s1503_s10, %s1498_s7 }
  0x19   : > { %p1507_p2 = scmp.lt.u32.totalorder %s1498_s7, %s1763_s29 }
  0x1a   : > { %p1501_p10 = pnand %p2245_p9, %p1499_p8  ;;  %p1506_p0 = por %p1505_p13, %p1504_p12 }
  0x1c   : > { %p1502_p11 = pneg %p1501_p10  ;;  %p1508_p3 = por %p1507_p2, %p1506_p0 }
  0x1e   : > { %p1509_p5 = pnand %p1508_p3, %p1502_p11 }
  0x20   : > { %1512 = shalt.err (!%p1509_p5)
}
  0x21   : > { %s1513_s20 = scalar_lea.vmem %s1765_s4, 32768  ;;  %s1674_s21 = smov [#allocation5]  }
  0x22   : > { %p1514_p6 = scmp.ne.s32.totalorder %s1765_s4, %s1513_s20  ;;  %s1518_s22 = sshll.u32 %s1674_s21, 4  ;;  %s1519_s22 = int_to_ptr.vmem [resolvable:$false] %s1518_s22 }
  0x23   : > { %s1520_s25 = scalar_lea.vmem %s1519_s22, 65536  ;;  %p1521_p4 = scmp.lt.s32.totalorder %s1765_s4, %s1519_s22 }
  0x24   : > { %p1516_p8 = pnand %p1514_p6, %p2245_p9  ;;  %p1522_p12 = scmp.lt.s32.totalorder %s1520_s25, %s1513_s20 }
  0x26   : > { %p1517_p10 = pneg %p1516_p8  ;;  %p1523_p13 = por %p1522_p12, %p1521_p4 }
  0x28   : > { %p1524_p0 = pnand %p1523_p13, %p1517_p10 }
  0x2a   : > { %1527 = shalt.err (!%p1524_p0)
}
  0x2b   : > { %s2241_s26 = smov 1024   ;;  %s2242_s27 = smov 64  }
  0x2c   : > { %1431 = dma.hbm_to_vmem [thread:$0]  (!%p1769_p7), %s1763_s29, 32768, %s1765_s4, %s1773_s6, %s2241_s26, %s2241_s26, %s2242_s27  }
  0x2d   : > { %s1805_s28 = sadd.s32 4294967295, %s1672_s17   ;;  %s1109_s30 = sadd.s32 4294967294, %s1672_s17  }
  0x2e   : > { %p78_p4 = scmp.ne.s32.totalorder %s1656_s13, %s1652_s12  ;;  %p2244_p11 = scmp.eq.s32.totalorder %s1805_s28, 0 }
  0x2f   : > { %p130_p2 = scmp.eq.s32.totalorder %s1805_s28, 1  ;;  %p136_p3 = scmp.eq.s32.totalorder %s1109_s30, 1 }
  0x30   : > { %p1110_p5 = scmp.ge.s32.totalorder %s1672_s17, 1  ;;  %p1815_p6 = por %p2244_p11, %p78_p4 }
  0x31   : > { %p1822_p8 = por %p130_p2, %p72_p1  ;;  %p1826_p10 = por %p136_p3, %p78_p4 }
  0x32   : > { %s2256_s7 = scalar_select %p1815_p6, 1, 0 }
  0x33   : > { %s2257_s29 = scalar_select %p1822_p8, 1, 0 }
  0x34   : > { %s2258_s4 = scalar_select %p1826_p10, 1, 0 }
  0x35   : > { %p143_p12 = scmp.lt.s32.totalorder %s1672_s17, 3  ;;  %s1677_s9 = smov [#allocation2]  }
  0x36   : > { %s159_s10 = sshll.u32 %s1677_s9, 4  ;;  %s1117_s11 = sshll.u32 %s175_s23, 1  ;;  %s160_s10 = int_to_ptr.vmem [resolvable:$true] %s159_s10 }
  0x37   : > { %p1831_p13 = pnand %p1110_p5, %p143_p12  ;;  %s1132_s19 = sshll.u32 %s1668_s16, 5 }
  0x38   : > { %s199_s20 = scalar_lea.vmem [#allocation7], %s1117_s11  ;;  %s1849_s26 = scalar_lea.hbm %s2239_s2, %s1132_s19 }
  0x39   : > { %s2259_s8 = scalar_select %p1831_p13, 1, 0 }
  0x3a   : > { %p1424_p0 = pneg %p1831_p13  ;;  %s207_s21 = sshll.u32 %s199_s20, 4  ;;  %s1851_s21 = int_to_ptr.vmem [resolvable:$true] %s207_s21 }
  0x3b   : > { %s1528_s27 = scalar_lea.hbm %s2237_s0, 4096 }
  0x3c   : > { %p1842_p1 = pnand %p1424_p0, %p2244_p11  ;;  %p1529_p4 = scmp.ne.s32.totalorder %s2237_s0, %s1528_s27 }
  0x3d   : > { %p1535_p12 = scmp.lt.u32.totalorder %s1528_s27, %s2237_s0 }
  0x3e   : > { %p1530_p2 = pneg %p1842_p1 }
  0x40   : > { %p1531_p3 = pnand %p1530_p2, %p1529_p4 }
  0x42   : > { %p1532_p5 = pneg %p1531_p3 }
  0x44   : > { %p1537_p0 = pnand %p1535_p12, %p1532_p5 }
  0x46   : > { %1540 = shalt.err (!%p1537_p0)
}
  0x47   : > { %s1541_s19 = scalar_lea.vmem %s160_s10, 4096  ;;  %p1549_p8 = scmp.lt.s32.totalorder %s160_s10, %s160_s10 }
  0x48   : > { %p1542_p11 = scmp.ne.s32.totalorder %s160_s10, %s1541_s19  ;;  %p1550_p6 = scmp.lt.s32.totalorder %s1541_s19, %s1541_s19 }
  0x4a   : > { %p1544_p9 = pnand %p1542_p11, %p1530_p2  ;;  %p1551_p13 = por %p1550_p6, %p1549_p8 }
  0x4c   : > { %p1545_p10 = pneg %p1544_p9 }
  0x4e   : > { %p1552_p7 = pnand %p1551_p13, %p1545_p10 }
  0x50   : > { %1555 = shalt.err (!%p1552_p7)
}
  0x51   : > { %s2261_s25 = smov 64   ;;  %s2262_s30 = smov 1024  }
  0x52   : > { %1427 = dma.hbm_to_vmem [thread:$0]  (!%p1842_p1), %s2237_s0, 4096, %s160_s10, [#allocation3], %s2262_s30, %s2262_s30, %s2261_s25  }
  0x53   : > { %s1556_s1 = scalar_lea.hbm %s1849_s26, 32  ;;  %p2263_p11 = scmp.ne.s32.totalorder %s2255_s5, 0 }
  0x54   : > { %p1557_p9 = scmp.ne.s32.totalorder %s1849_s26, %s1556_s1  ;;  %s1561_s22 = scalar_lea.hbm %s2239_s2, 64 }
  0x55   : > { %p2264_p6 = pneg %p2263_p11  ;;  %p1562_p10 = scmp.lt.u32.totalorder %s1849_s26, %s2239_s2 }
  0x56   : > { %p1563_p13 = scmp.lt.u32.totalorder %s1561_s22, %s1556_s1  ;;  %p1565_p2 = scmp.lt.u32.totalorder %s1556_s1, %s1849_s26 }
  0x57   : > { %p1559_p8 = pnand %p1557_p9, %p2264_p6 }
  0x58   : > { %p1564_p4 = por %p1563_p13, %p1562_p10 }
  0x59   : > { %p1560_p7 = pneg %p1559_p8 }
  0x5a   : > { %p1566_p3 = por %p1565_p2, %p1564_p4 }
  0x5c   : > { %p1567_p5 = pnand %p1566_p3, %p1560_p7 }
  0x5e   : > { %1570 = shalt.err (!%p1567_p5)
}
  0x5f   : > { %s1571_s10 = scalar_lea.vmem %s1851_s21, 32  ;;  %p2265_p12 = pmov %p2264_p6 }
  0x60   : > { %p1572_p1 = scmp.ne.s32.totalorder %s1851_s21, %s1571_s10  ;;  %s1678_s19 = smov [#allocation7]  }
  0x61   : > { %s1576_s25 = sshll.u32 %s1678_s19, 4  ;;  %s1577_s25 = int_to_ptr.vmem [resolvable:$false] %s1576_s25 }
  0x62   : > { %p1574_p0 = pnand %p1572_p1, %p2265_p12  ;;  %s1578_s30 = scalar_lea.vmem %s1577_s25, 64 }
  0x63   : > { %p1579_p6 = scmp.lt.s32.totalorder %s1851_s21, %s1577_s25  ;;  %p1580_p8 = scmp.lt.s32.totalorder %s1578_s30, %s1571_s10 }
  0x64   : > { %p1575_p9 = pneg %p1574_p0 }
  0x65   : > { %p1581_p10 = por %p1580_p8, %p1579_p6 }
  0x67   : > { %p1582_p13 = pnand %p1581_p10, %p1575_p9 }
  0x69   : > { %1585 = shalt.err (!%p1582_p13)
}
  0x6a   : > { %1434 = dma.hbm_to_vmem [thread:$0]  (!%p2263_p11), %s1849_s26, 32, %s1851_s21, %s1773_s6  }
  0x6b   : > { %p2266_p7 = scmp.ne.s32.totalorder %s2259_s8, 0 }
  0x6c   : > { %p2267_p4 = scmp.eq.s32.totalorder (!%p2266_p7), %s1805_s28, 0 }
  0x6d   : > { %216 = sbr.rel (%p2266_p7) target bundleno = 636 (0x27c), region = 32 }
  0x74   : > { %1639 = dma.done.wait (%p2267_p4), [#allocation3], 4096   ;;  %p2268_p2 = pmov %p2267_p4 }
  0x75   : > { %s222_s23 = sand.u32 1, %s1805_s28   ;;  %s1904_s9 = sand.u32 1, %s1656_s13  }
  0x76   : > { %1641 = vsyncadd (%p2268_p2), [#allocation3], 4294963200  ;;  %s1122_s5 = sshll.u32 %s1904_s9, 11  ;;  %s223_s1 = scalar_lea.sflag [#allocation6], %s222_s23 }
  0x77   : > { %s1907_s18 = scalar_lea.vmem [#allocation5], %s1122_s5  ;;  %p2269_p11 = scmp.ne.s32.totalorder %s2256_s7, 0 }
  0x79   : > { %1643 = dma.done.wait (%p2269_p11), %s223_s1, 32800  }
  0x7a   : > { %1645 = vsyncadd (%p2269_p11), %s223_s1, 4294934496  ;;  %v301_v0 = vld [vmem:[%s1907_s18 + $0x8] sm:$0xff]  ;;  %v300_v5 = vld [vmem:[%s1907_s18] sm:$0xff]  ;;  %s1123_s6 = sshll.u32 %s1904_s9, 1  ;;  %s1124_s28 = sshll.u32 %s1904_s9, 6 }
  0x7b   : > { %v309_v1 = vld [vmem:[%s1907_s18 + $0x48] sm:$0xff]  ;;  %v308_v6 = vld [vmem:[%s1907_s18 + $0x40] sm:$0xff]  ;;  %s235_s26 = scalar_lea.vmem [#allocation7], %s1123_s6  ;;  %s2171_s7 = scalar_lea.vmem [#allocation8], %s1124_s28 }
  0x7c   : > { %v305_v2 = vld [vmem:[%s1907_s18 + $0x28] sm:$0xff]  ;;  %v1134_v3 = vpack.c.bf16 %v309_v1, %v301_v0  ;;  %v1136_v8 = vpack.c.bf16 %v308_v6, %v300_v5  ;;  %v304_v9 = vld [vmem:[%s1907_s18 + $0x20] sm:$0xff]  ;;  %s990_s8 = sshll.u32 %s2171_s7, 4  ;;  %s1133_s21 = sshll.u32 %s1664_s15, 8  ;;  %s2180_s8 = int_to_ptr.vmem [resolvable:$true] %s990_s8 }
  0x7d   : > { %v313_v4 = vld [vmem:[%s1907_s18 + $0x68] sm:$0xff]  ;;  %v312_v10 = vld [vmem:[%s1907_s18 + $0x60] sm:$0xff]  ;;  %s2186_s11 = scalar_lea.hbm %s2240_s3, %s1133_s21  ;;  %s974_s15 = scalar_lea.sflag [#allocation4], %s1904_s9 }
  0x7e   : > { %v1262_v7 = vpack.c.bf16 %v313_v4, %v305_v2  ;;  %v317_v11 = vld [vmem:[%s1907_s18 + $0x88] sm:$0xff]  ;;  %1135 = vmatprep.subr.bf16.mxu1 %v1134_v3  ;;  %v1264_v12 = vpack.c.bf16 %v312_v10, %v304_v9  ;;  %v316_v18 = vld [vmem:[%s1907_s18 + $0x80] sm:$0xff]  ;;  %s1586_s20 = scalar_lea.vmem %s2180_s8, 1024  ;;  %p2270_p5 = scmp.ne.s32.totalorder %s2257_s29, 0 }
  0x7f   : > { %v325_v13 = vld [vmem:[%s1907_s18 + $0xc8] sm:$0xff]  ;;  %1137 = vmatpush1.bf16.xpose.msra.mxu1 %v1136_v8  ;;  %v324_v19 = vld [vmem:[%s1907_s18 + $0xc0] sm:$0xff]  ;;  %p1587_p3 = scmp.ne.s32.totalorder %s2180_s8, %s1586_s20  ;;  %s1680_s10 = smov [#allocation8]  }
  0x80   : > { %v321_v14 = vld [vmem:[%s1907_s18 + $0xa8] sm:$0xff]  ;;  %1263 = vmatprep.subr.bf16.mxu0 %v1262_v7  ;;  %v1138_v16 = vpack.c.bf16 %v325_v13, %v317_v11  ;;  %v320_v20 = vld [vmem:[%s1907_s18 + $0xa0] sm:$0xff]  ;;  %v1140_v26 = vpack.c.bf16 %v324_v19, %v316_v18  ;;  %s1590_s19 = sshll.u32 %s1680_s10, 4  ;;  %s1591_s19 = int_to_ptr.vmem [resolvable:$false] %s1590_s19 }
  0x81   : > { %v329_v15 = vld [vmem:[%s1907_s18 + $0xe8] sm:$0xff]  ;;  %1265 = vmatpush1.bf16.xpose.msra.mxu0 %v1264_v12  ;;  %v328_v21 = vld [vmem:[%s1907_s18 + $0xe0] sm:$0xff]  ;;  %p1588_p1 = pnand %p1587_p3, %p2270_p5  ;;  %s1592_s25 = scalar_lea.vmem %s1591_s19, 2048 }
  0x82   : > { %v1266_v17 = vpack.c.bf16 %v329_v15, %v321_v14  ;;  %1139 = vmatprep.subr.bf16.mxu1 %v1138_v16  ;;  %v333_v22 = vld [vmem:[%s1907_s18 + $0x108] sm:$0xff]  ;;  %v1268_v27 = vpack.c.bf16 %v328_v21, %v320_v20  ;;  %v332_v30 = vld [vmem:[%s1907_s18 + $0x100] sm:$0xff]  ;;  %p1593_p0 = scmp.lt.s32.totalorder %s2180_s8, %s1591_s19  ;;  %p1594_p9 = scmp.lt.s32.totalorder %s1592_s25, %s1586_s20 }
  0x83   : > { %v341_v23 = vld [vmem:[%s1907_s18 + $0x148] sm:$0xff]  ;;  %v340_v31 = vld [vmem:[%s1907_s18 + $0x140] sm:$0xff]  ;;  %p1589_p12 = pneg %p1588_p1 }
  0x84   : > { %1267 = vmatprep.subr.bf16.mxu0 %v1266_v17  ;;  %v337_v24 = vld [vmem:[%s1907_s18 + $0x128] sm:$0xff]  ;;  %v1142_v28 = vpack.c.bf16 %v341_v23, %v333_v22  ;;  %v336_v32 = vld [vmem:[%s1907_s18 + $0x120] sm:$0xff]  ;;  %v1144_v38 = vpack.c.bf16 %v340_v31, %v332_v30  ;;  %p1595_p6 = por %p1594_p9, %p1593_p0 }
  0x85   : > { %v345_v25 = vld [vmem:[%s1907_s18 + $0x168] sm:$0xff]  ;;  %v344_v33 = vld [vmem:[%s1907_s18 + $0x160] sm:$0xff] }
  0x86   : > { %v1270_v29 = vpack.c.bf16 %v345_v25, %v337_v24  ;;  %v349_v34 = vld [vmem:[%s1907_s18 + $0x188] sm:$0xff]  ;;  %v1272_v39 = vpack.c.bf16 %v344_v33, %v336_v32  ;;  %v348_v42 = vld [vmem:[%s1907_s18 + $0x180] sm:$0xff]  ;;  %p1596_p8 = pnand %p1595_p6, %p1589_p12 }
  0x87   : > { %1141 = vmatpush1.bf16.xpose.msra.mxu1 %v1140_v26  ;;  %v357_v35 = vld [vmem:[%s1907_s18 + $0x1c8] sm:$0xff]  ;;  %v356_v43 = vld [vmem:[%s1907_s18 + $0x1c0] sm:$0xff] }
  0x88   : > { %1143 = vmatprep.subr.bf16.mxu1 %v1142_v28  ;;  %v353_v36 = vld [vmem:[%s1907_s18 + $0x1a8] sm:$0xff]  ;;  %v1146_v40 = vpack.c.bf16 %v357_v35, %v349_v34  ;;  %v352_v44 = vld [vmem:[%s1907_s18 + $0x1a0] sm:$0xff]  ;;  %v1148_v50 = vpack.c.bf16 %v356_v43, %v348_v42 }
  0x89   : > { %1269 = vmatpush1.bf16.xpose.msra.mxu0 %v1268_v27  ;;  %v361_v37 = vld [vmem:[%s1907_s18 + $0x1e8] sm:$0xff]  ;;  %v360_v45 = vld [vmem:[%s1907_s18 + $0x1e0] sm:$0xff] }
  0x8a   : > { %1271 = vmatprep.subr.bf16.mxu0 %v1270_v29  ;;  %v1274_v41 = vpack.c.bf16 %v361_v37, %v353_v36  ;;  %v365_v46 = vld [vmem:[%s1907_s18 + $0x208] sm:$0xff]  ;;  %v1276_v51 = vpack.c.bf16 %v360_v45, %v352_v44  ;;  %v364_v54 = vld [vmem:[%s1907_s18 + $0x200] sm:$0xff] }
  0x8b   : > { %v373_v47 = vld [vmem:[%s1907_s18 + $0x248] sm:$0xff]  ;;  %v372_v55 = vld [vmem:[%s1907_s18 + $0x240] sm:$0xff] }
  0x8c   : > { %v369_v48 = vld [vmem:[%s1907_s18 + $0x228] sm:$0xff]  ;;  %v1150_v52 = vpack.c.bf16 %v373_v47, %v365_v46  ;;  %v368_v56 = vld [vmem:[%s1907_s18 + $0x220] sm:$0xff]  ;;  %v1152_v62 = vpack.c.bf16 %v372_v55, %v364_v54 }
  0x8d   : > { %v377_v49 = vld [vmem:[%s1907_s18 + $0x268] sm:$0xff]  ;;  %v376_v57 = vld [vmem:[%s1907_s18 + $0x260] sm:$0xff] }
  0x8e   : > { %v1278_v53 = vpack.c.bf16 %v377_v49, %v369_v48  ;;  %v381_v58 = vld [vmem:[%s1907_s18 + $0x288] sm:$0xff]  ;;  %v1280_v63 = vpack.c.bf16 %v376_v57, %v368_v56  ;;  %v380_v2 = vld [vmem:[%s1907_s18 + $0x280] sm:$0xff] }
  0x8f   : > { %1145 = vmatpush1.bf16.xpose.msra.mxu1 %v1144_v38  ;;  %v389_v59 = vld [vmem:[%s1907_s18 + $0x2c8] sm:$0xff]  ;;  %v388_v3 = vld [vmem:[%s1907_s18 + $0x2c0] sm:$0xff] }
  0x90   : > { %1147 = vmatprep.subr.bf16.mxu1 %v1146_v40  ;;  %v385_v60 = vld [vmem:[%s1907_s18 + $0x2a8] sm:$0xff]  ;;  %v1154_v0 = vpack.c.bf16 %v389_v59, %v381_v58  ;;  %v384_v4 = vld [vmem:[%s1907_s18 + $0x2a0] sm:$0xff]  ;;  %v1156_v10 = vpack.c.bf16 %v388_v3, %v380_v2 }
  0x91   : > { %1273 = vmatpush1.bf16.xpose.msra.mxu0 %v1272_v39  ;;  %v393_v61 = vld [vmem:[%s1907_s18 + $0x2e8] sm:$0xff]  ;;  %v392_v5 = vld [vmem:[%s1907_s18 + $0x2e0] sm:$0xff] }
  0x92   : > { %1275 = vmatprep.subr.bf16.mxu0 %v1274_v41  ;;  %v1282_v1 = vpack.c.bf16 %v393_v61, %v385_v60  ;;  %v397_v6 = vld [vmem:[%s1907_s18 + $0x308] sm:$0xff]  ;;  %v1284_v11 = vpack.c.bf16 %v392_v5, %v384_v4  ;;  %v396_v16 = vld [vmem:[%s1907_s18 + $0x300] sm:$0xff] }
  0x93   : > { %v405_v7 = vld [vmem:[%s1907_s18 + $0x348] sm:$0xff]  ;;  %v404_v17 = vld [vmem:[%s1907_s18 + $0x340] sm:$0xff] }
  0x94   : > { %v401_v8 = vld [vmem:[%s1907_s18 + $0x328] sm:$0xff]  ;;  %v1158_v12 = vpack.c.bf16 %v405_v7, %v397_v6  ;;  %v400_v18 = vld [vmem:[%s1907_s18 + $0x320] sm:$0xff]  ;;  %v1160_v24 = vpack.c.bf16 %v404_v17, %v396_v16 }
  0x95   : > { %v409_v9 = vld [vmem:[%s1907_s18 + $0x368] sm:$0xff]  ;;  %v408_v19 = vld [vmem:[%s1907_s18 + $0x360] sm:$0xff] }
  0x96   : > { %v1286_v13 = vpack.c.bf16 %v409_v9, %v401_v8  ;;  %v269_v14 = vld [vmem:[#allocation2 + $0x8] sm:$0xff]  ;;  %v1288_v25 = vpack.c.bf16 %v408_v19, %v400_v18  ;;  %v412_v28 = vld [vmem:[%s1907_s18 + $0x380] sm:$0xff] }
  0x97   : > { %1149 = vmatpush1.bf16.xpose.msra.mxu1 %v1148_v50  ;;  %620 = vmatprep.mubr.f32.mxu1 %v269_v14  ;;  %v273_v15 = vld [vmem:[#allocation2 + $0x28] sm:$0xff]  ;;  %v420_v29 = vld [vmem:[%s1907_s18 + $0x3c0] sm:$0xff] }
  0x98   : > { %1151 = vmatprep.subr.bf16.mxu1 %v1150_v52  ;;  %798 = vmatprep.mubr.f32.mxu0 %v273_v15  ;;  %v413_v20 = vld [vmem:[%s1907_s18 + $0x388] sm:$0xff]  ;;  %v416_v30 = vld [vmem:[%s1907_s18 + $0x3a0] sm:$0xff]  ;;  %v1164_v36 = vpack.c.bf16 %v420_v29, %v412_v28 }
  0x99   : > { %1277 = vmatpush1.bf16.xpose.msra.mxu0 %v1276_v51  ;;  %v421_v21 = vld [vmem:[%s1907_s18 + $0x3c8] sm:$0xff]  ;;  %v424_v31 = vld [vmem:[%s1907_s18 + $0x3e0] sm:$0xff] }
  0x9a   : > { %1279 = vmatprep.subr.bf16.mxu0 %v1278_v53  ;;  %v417_v22 = vld [vmem:[%s1907_s18 + $0x3a8] sm:$0xff]  ;;  %v1162_v26 = vpack.c.bf16 %v421_v21, %v413_v20  ;;  %v1292_v37 = vpack.c.bf16 %v424_v31, %v416_v30  ;;  %v428_v40 = vld [vmem:[%s1907_s18 + $0x400] sm:$0xff] }
  0x9b   : > { %v425_v23 = vld [vmem:[%s1907_s18 + $0x3e8] sm:$0xff]  ;;  %v436_v41 = vld [vmem:[%s1907_s18 + $0x440] sm:$0xff] }
  0x9c   : > { %v1290_v27 = vpack.c.bf16 %v425_v23, %v417_v22  ;;  %v429_v32 = vld [vmem:[%s1907_s18 + $0x408] sm:$0xff]  ;;  %v432_v42 = vld [vmem:[%s1907_s18 + $0x420] sm:$0xff]  ;;  %v1168_v48 = vpack.c.bf16 %v436_v41, %v428_v40 }
  0x9d   : > { %v437_v33 = vld [vmem:[%s1907_s18 + $0x448] sm:$0xff]  ;;  %v440_v43 = vld [vmem:[%s1907_s18 + $0x460] sm:$0xff] }
  0x9e   : > { %v433_v34 = vld [vmem:[%s1907_s18 + $0x428] sm:$0xff]  ;;  %v1166_v38 = vpack.c.bf16 %v437_v33, %v429_v32  ;;  %v1296_v49 = vpack.c.bf16 %v440_v43, %v432_v42  ;;  %v444_v52 = vld [vmem:[%s1907_s18 + $0x480] sm:$0xff] }
  0x9f   : > { %1153 = vmatpush1.bf16.xpose.msra.mxu1 %v1152_v62  ;;  %v441_v35 = vld [vmem:[%s1907_s18 + $0x468] sm:$0xff]  ;;  %v452_v53 = vld [vmem:[%s1907_s18 + $0x4c0] sm:$0xff] }
  0xa0   : > { %1155 = vmatprep.subr.bf16.mxu1 %v1154_v0  ;;  %v1294_v39 = vpack.c.bf16 %v441_v35, %v433_v34  ;;  %v445_v44 = vld [vmem:[%s1907_s18 + $0x488] sm:$0xff]  ;;  %v448_v54 = vld [vmem:[%s1907_s18 + $0x4a0] sm:$0xff]  ;;  %v1172_v60 = vpack.c.bf16 %v452_v53, %v444_v52 }
  0xa1   : > { %1281 = vmatpush1.bf16.xpose.msra.mxu0 %v1280_v63  ;;  %v453_v45 = vld [vmem:[%s1907_s18 + $0x4c8] sm:$0xff]  ;;  %v456_v55 = vld [vmem:[%s1907_s18 + $0x4e0] sm:$0xff] }
  0xa2   : > { %1283 = vmatprep.subr.bf16.mxu0 %v1282_v1  ;;  %v449_v46 = vld [vmem:[%s1907_s18 + $0x4a8] sm:$0xff]  ;;  %v1170_v50 = vpack.c.bf16 %v453_v45, %v445_v44  ;;  %v1300_v61 = vpack.c.bf16 %v456_v55, %v448_v54  ;;  %v460_v0 = vld [vmem:[%s1907_s18 + $0x500] sm:$0xff] }
  0xa3   : > { %v457_v47 = vld [vmem:[%s1907_s18 + $0x4e8] sm:$0xff]  ;;  %v468_v1 = vld [vmem:[%s1907_s18 + $0x540] sm:$0xff] }
  0xa4   : > { %v1298_v51 = vpack.c.bf16 %v457_v47, %v449_v46  ;;  %v461_v56 = vld [vmem:[%s1907_s18 + $0x508] sm:$0xff]  ;;  %v464_v2 = vld [vmem:[%s1907_s18 + $0x520] sm:$0xff]  ;;  %v1176_v8 = vpack.c.bf16 %v468_v1, %v460_v0  ;;  %v303_v0 = vld [vmem:[%s1907_s18 + $0x18] sm:$0xff] }
  0xa5   : > { %v469_v57 = vld [vmem:[%s1907_s18 + $0x548] sm:$0xff]  ;;  %v472_v3 = vld [vmem:[%s1907_s18 + $0x560] sm:$0xff]  ;;  %v311_v1 = vld [vmem:[%s1907_s18 + $0x58] sm:$0xff] }
  0xa6   : > { %v465_v58 = vld [vmem:[%s1907_s18 + $0x528] sm:$0xff]  ;;  %v1174_v62 = vpack.c.bf16 %v469_v57, %v461_v56  ;;  %v1304_v9 = vpack.c.bf16 %v472_v3, %v464_v2  ;;  %v480_v14 = vld [vmem:[%s1907_s18 + $0x5a0] sm:$0xff]  ;;  %v307_v2 = vld [vmem:[%s1907_s18 + $0x38] sm:$0xff] }
  0xa7   : > { %1157 = vmatpush1.bf16.xpose.msra.mxu1 %v1156_v10  ;;  %v473_v59 = vld [vmem:[%s1907_s18 + $0x568] sm:$0xff]  ;;  %v488_v15 = vld [vmem:[%s1907_s18 + $0x5e0] sm:$0xff]  ;;  %v315_v3 = vld [vmem:[%s1907_s18 + $0x78] sm:$0xff] }
  0xa8   : > { %1159 = vmatprep.subr.bf16.mxu1 %v1158_v12  ;;  %v1302_v63 = vpack.c.bf16 %v473_v59, %v465_v58  ;;  %v477_v4 = vld [vmem:[%s1907_s18 + $0x588] sm:$0xff]  ;;  %v476_v12 = vld [vmem:[%s1907_s18 + $0x580] sm:$0xff]  ;;  %v1308_v21 = vpack.c.bf16 %v488_v15, %v480_v14  ;;  %v323_v14 = vld [vmem:[%s1907_s18 + $0xb8] sm:$0xff] }
  0xa9   : > { %1285 = vmatpush1.bf16.xpose.msra.mxu0 %v1284_v11  ;;  %v485_v5 = vld [vmem:[%s1907_s18 + $0x5c8] sm:$0xff]  ;;  %v331_v15 = vld [vmem:[%s1907_s18 + $0xf8] sm:$0xff] }
  0xaa   : > { %1287 = vmatprep.subr.bf16.mxu0 %v1286_v13  ;;  %v481_v6 = vld [vmem:[%s1907_s18 + $0x5a8] sm:$0xff]  ;;  %v1178_v10 = vpack.c.bf16 %v485_v5, %v477_v4  ;;  %v484_v13 = vld [vmem:[%s1907_s18 + $0x5c0] sm:$0xff] }
  0xab   : > { %v489_v7 = vld [vmem:[%s1907_s18 + $0x5e8] sm:$0xff]  ;;  %v1180_v20 = vpack.c.bf16 %v484_v13, %v476_v12  ;;  %v319_v12 = vld [vmem:[%s1907_s18 + $0x98] sm:$0xff] }
  0xac   : > { %v1306_v11 = vpack.c.bf16 %v489_v7, %v481_v6  ;;  %v493_v16 = vld [vmem:[%s1907_s18 + $0x608] sm:$0xff]  ;;  %v1198_v6 = vpack.c.bf16 %v311_v1, %v303_v0  ;;  %v1326_v7 = vpack.c.bf16 %v315_v3, %v307_v2  ;;  %v327_v13 = vld [vmem:[%s1907_s18 + $0xd8] sm:$0xff] }
  0xad   : > { %v501_v17 = vld [vmem:[%s1907_s18 + $0x648] sm:$0xff]  ;;  %v367_v0 = vld [vmem:[%s1907_s18 + $0x218] sm:$0xff] }
  0xae   : > { %v497_v18 = vld [vmem:[%s1907_s18 + $0x628] sm:$0xff]  ;;  %v1182_v22 = vpack.c.bf16 %v501_v17, %v493_v16  ;;  %v268_v16 = vld [vmem:[#allocation2] sm:$0xff]  ;;  %v375_v1 = vld [vmem:[%s1907_s18 + $0x258] sm:$0xff] }
  0xaf   : > { %1161 = vmatpush1.bf16.xpose.msra.mxu1 %v1160_v24  ;;  %v505_v19 = vld [vmem:[%s1907_s18 + $0x668] sm:$0xff]  ;;  %v492_v24 = vld [vmem:[%s1907_s18 + $0x600] sm:$0xff]  ;;  %v371_v2 = vld [vmem:[%s1907_s18 + $0x238] sm:$0xff] }
  0xb0   : > { %1163 = vmatprep.subr.bf16.mxu1 %v1162_v26  ;;  %v1310_v23 = vpack.c.bf16 %v505_v19, %v497_v18  ;;  %v496_v26 = vld [vmem:[%s1907_s18 + $0x620] sm:$0xff]  ;;  %v509_v28 = vld [vmem:[%s1907_s18 + $0x688] sm:$0xff]  ;;  %v379_v3 = vld [vmem:[%s1907_s18 + $0x278] sm:$0xff] }
  0xb1   : > { %1289 = vmatpush1.bf16.xpose.msra.mxu0 %v1288_v25  ;;  %v500_v25 = vld [vmem:[%s1907_s18 + $0x640] sm:$0xff]  ;;  %v517_v29 = vld [vmem:[%s1907_s18 + $0x6c8] sm:$0xff] }
  0xb2   : > { %1291 = vmatprep.subr.bf16.mxu0 %v1290_v27  ;;  %v504_v27 = vld [vmem:[%s1907_s18 + $0x660] sm:$0xff]  ;;  %v513_v30 = vld [vmem:[%s1907_s18 + $0x6a8] sm:$0xff]  ;;  %v1184_v32 = vpack.c.bf16 %v500_v25, %v492_v24  ;;  %v1186_v34 = vpack.c.bf16 %v517_v29, %v509_v28  ;;  %v322_v25 = vld [vmem:[%s1907_s18 + $0xb0] sm:$0xff] }
  0xb3   : > { %v521_v31 = vld [vmem:[%s1907_s18 + $0x6e8] sm:$0xff]  ;;  %v1312_v33 = vpack.c.bf16 %v504_v27, %v496_v26  ;;  %v272_v18 = vld [vmem:[#allocation2 + $0x20] sm:$0xff]  ;;  %v330_v28 = vld [vmem:[%s1907_s18 + $0xf0] sm:$0xff] }
  0xb4   : > { %v1314_v35 = vpack.c.bf16 %v521_v31, %v513_v30  ;;  %v525_v40 = vld [vmem:[%s1907_s18 + $0x708] sm:$0xff]  ;;  %v276_v27 = vld [vmem:[#allocation2 + $0x40] sm:$0xff]  ;;  %v335_v31 = vld [vmem:[%s1907_s18 + $0x118] sm:$0xff] }
  0xb5   : > { %v533_v41 = vld [vmem:[%s1907_s18 + $0x748] sm:$0xff]  ;;  %v280_v29 = vld [vmem:[#allocation2 + $0x60] sm:$0xff] }
  0xb6   : > { %v529_v42 = vld [vmem:[%s1907_s18 + $0x728] sm:$0xff]  ;;  %v1190_v46 = vpack.c.bf16 %v533_v41, %v525_v40  ;;  %v288_v40 = vld [vmem:[#allocation2 + $0xa0] sm:$0xff] }
  0xb7   : > { %1165 = vmatpush1.bf16.xpose.msra.mxu1 %v1164_v36  ;;  %v508_v36 = vld [vmem:[%s1907_s18 + $0x680] sm:$0xff]  ;;  %v537_v43 = vld [vmem:[%s1907_s18 + $0x768] sm:$0xff] }
  0xb8   : > { %1167 = vmatprep.subr.bf16.mxu1 %v1166_v38  ;;  %v512_v38 = vld [vmem:[%s1907_s18 + $0x6a0] sm:$0xff]  ;;  %v1318_v47 = vpack.c.bf16 %v537_v43, %v529_v42  ;;  %v541_v52 = vld [vmem:[%s1907_s18 + $0x788] sm:$0xff]  ;;  %v334_v42 = vld [vmem:[%s1907_s18 + $0x110] sm:$0xff] }
  0xb9   : > { %1293 = vmatpush1.bf16.xpose.msra.mxu0 %v1292_v37  ;;  %v516_v37 = vld [vmem:[%s1907_s18 + $0x6c0] sm:$0xff]  ;;  %v549_v53 = vld [vmem:[%s1907_s18 + $0x7c8] sm:$0xff]  ;;  %v342_v43 = vld [vmem:[%s1907_s18 + $0x150] sm:$0xff] }
  0xba   : > { %1295 = vmatprep.subr.bf16.mxu0 %v1294_v39  ;;  %v520_v39 = vld [vmem:[%s1907_s18 + $0x6e0] sm:$0xff]  ;;  %v1188_v44 = vpack.c.bf16 %v516_v37, %v508_v36  ;;  %v545_v54 = vld [vmem:[%s1907_s18 + $0x7a8] sm:$0xff]  ;;  %v1194_v58 = vpack.c.bf16 %v549_v53, %v541_v52  ;;  %v359_v52 = vld [vmem:[%s1907_s18 + $0x1d8] sm:$0xff] }
  0xbb   : > { %v1316_v45 = vpack.c.bf16 %v520_v39, %v512_v38  ;;  %v553_v55 = vld [vmem:[%s1907_s18 + $0x7e8] sm:$0xff]  ;;  %v284_v37 = vld [vmem:[#allocation2 + $0x80] sm:$0xff]  ;;  %v1332_v38 = vpack.c.bf16 %v330_v28, %v322_v25  ;;  %v275_v53 = vld [vmem:[#allocation2 + $0x38] sm:$0xff] }
  0xbc   : > { %v1322_v59 = vpack.c.bf16 %v553_v55, %v545_v54  ;;  %v277_v24 = vld [vmem:[#allocation2 + $0x48] sm:$0xff]  ;;  %v355_v54 = vld [vmem:[%s1907_s18 + $0x1b8] sm:$0xff] }
  0xbd   : > { %v281_v26 = vld [vmem:[#allocation2 + $0x68] sm:$0xff]  ;;  %v363_v55 = vld [vmem:[%s1907_s18 + $0x1f8] sm:$0xff] }
  0xbe   : > { %v285_v30 = vld [vmem:[#allocation2 + $0x88] sm:$0xff]  ;;  %v407_v25 = vld [vmem:[%s1907_s18 + $0x358] sm:$0xff] }
  0xbf   : > { %1169 = vmatpush1.bf16.xpose.msra.mxu1 %v1168_v48  ;;  %v524_v48 = vld [vmem:[%s1907_s18 + $0x700] sm:$0xff] }
  0xc0   : > { %1171 = vmatprep.subr.bf16.mxu1 %v1170_v50  ;;  %v528_v50 = vld [vmem:[%s1907_s18 + $0x720] sm:$0xff] }
  0xc1   : > { %1297 = vmatpush1.bf16.xpose.msra.mxu0 %v1296_v49  ;;  %v532_v49 = vld [vmem:[%s1907_s18 + $0x740] sm:$0xff] }
  0xc2   : > { %1299 = vmatprep.subr.bf16.mxu0 %v1298_v51  ;;  %v536_v51 = vld [vmem:[%s1907_s18 + $0x760] sm:$0xff]  ;;  %v1192_v56 = vpack.c.bf16 %v532_v49, %v524_v48  ;;  %v346_v48 = vld [vmem:[%s1907_s18 + $0x170] sm:$0xff] }
  0xc3   : > { %v1320_v57 = vpack.c.bf16 %v536_v51, %v528_v50  ;;  %v296_v49 = vld [vmem:[#allocation2 + $0xe0] sm:$0xff]  ;;  %v271_v50 = vld [vmem:[#allocation2 + $0x18] sm:$0xff] }
  0xc4   : > { %v351_v51 = vld [vmem:[%s1907_s18 + $0x198] sm:$0xff] }
  0xc7   : > { %1173 = vmatpush1.bf16.xpose.msra.mxu1 %v1172_v60  ;;  %v540_v60 = vld [vmem:[%s1907_s18 + $0x780] sm:$0xff] }
  0xc8   : > { %1175 = vmatprep.subr.bf16.mxu1 %v1174_v62  ;;  %v544_v62 = vld [vmem:[%s1907_s18 + $0x7a0] sm:$0xff] }
  0xc9   : > { %1301 = vmatpush1.bf16.xpose.msra.mxu0 %v1300_v61  ;;  %v548_v61 = vld [vmem:[%s1907_s18 + $0x7c0] sm:$0xff] }
  0xca   : > { %1303 = vmatprep.subr.bf16.mxu0 %v1302_v63  ;;  %v552_v63 = vld [vmem:[%s1907_s18 + $0x7e0] sm:$0xff]  ;;  %v1196_v4 = vpack.c.bf16 %v548_v61, %v540_v60  ;;  %v350_v60 = vld [vmem:[%s1907_s18 + $0x190] sm:$0xff] }
  0xcb   : > { %v1324_v5 = vpack.c.bf16 %v552_v63, %v544_v62  ;;  %v358_v61 = vld [vmem:[%s1907_s18 + $0x1d0] sm:$0xff] }
  0xcc   : > { %v354_v62 = vld [vmem:[%s1907_s18 + $0x1b0] sm:$0xff] }
  0xcd   : > { %v362_v63 = vld [vmem:[%s1907_s18 + $0x1f0] sm:$0xff] }
  0xcf   : > { %1177 = vmatpush1.bf16.xpose.msra.mxu1 %v1176_v8  ;;  %v302_v8 = vld [vmem:[%s1907_s18 + $0x10] sm:$0xff] }
  0xd0   : > { %1179 = vmatprep.subr.bf16.mxu1 %v1178_v10  ;;  %v306_v10 = vld [vmem:[%s1907_s18 + $0x30] sm:$0xff] }
  0xd1   : > { %1305 = vmatpush1.bf16.xpose.msra.mxu0 %v1304_v9  ;;  %v310_v9 = vld [vmem:[%s1907_s18 + $0x50] sm:$0xff] }
  0xd2   : > { %1307 = vmatprep.subr.bf16.mxu0 %v1306_v11  ;;  %v314_v11 = vld [vmem:[%s1907_s18 + $0x70] sm:$0xff]  ;;  %v1200_v17 = vpack.c.bf16 %v310_v9, %v302_v8 }
  0xd3   : > { %v1328_v19 = vpack.c.bf16 %v314_v11, %v306_v10  ;;  %v366_v8 = vld [vmem:[%s1907_s18 + $0x210] sm:$0xff] }
  0xd4   : > { %v374_v9 = vld [vmem:[%s1907_s18 + $0x250] sm:$0xff] }
  0xd5   : > { %v370_v10 = vld [vmem:[%s1907_s18 + $0x230] sm:$0xff] }
  0xd6   : > { %v378_v11 = vld [vmem:[%s1907_s18 + $0x270] sm:$0xff] }
  0xd7   : > { %1181 = vmatpush1.bf16.xpose.msra.mxu1 %v1180_v20  ;;  %v1202_v20 = vpack.c.bf16 %v327_v13, %v319_v12  ;;  %v383_v12 = vld [vmem:[%s1907_s18 + $0x298] sm:$0xff] }
  0xd8   : > { %1183 = vmatprep.subr.bf16.mxu1 %v1182_v22  ;;  %v318_v22 = vld [vmem:[%s1907_s18 + $0x90] sm:$0xff]  ;;  %v391_v13 = vld [vmem:[%s1907_s18 + $0x2d8] sm:$0xff] }
  0xd9   : > { %1309 = vmatpush1.bf16.xpose.msra.mxu0 %v1308_v21  ;;  %v1330_v21 = vpack.c.bf16 %v331_v15, %v323_v14  ;;  %v387_v14 = vld [vmem:[%s1907_s18 + $0x2b8] sm:$0xff] }
  0xda   : > { %1311 = vmatprep.subr.bf16.mxu0 %v1310_v23  ;;  %v326_v23 = vld [vmem:[%s1907_s18 + $0xd0] sm:$0xff]  ;;  %v395_v15 = vld [vmem:[%s1907_s18 + $0x2f8] sm:$0xff] }
  0xdb   : > { %v1204_v36 = vpack.c.bf16 %v326_v23, %v318_v22  ;;  %v386_v22 = vld [vmem:[%s1907_s18 + $0x2b0] sm:$0xff] }
  0xdc   : > { %v394_v23 = vld [vmem:[%s1907_s18 + $0x2f0] sm:$0xff] }
  0xdf   : > { %1185 = vmatpush1.bf16.xpose.msra.mxu1 %v1184_v32  ;;  %v343_v32 = vld [vmem:[%s1907_s18 + $0x158] sm:$0xff] }
  0xe0   : > { %1187 = vmatprep.subr.bf16.mxu1 %v1186_v34  ;;  %v339_v34 = vld [vmem:[%s1907_s18 + $0x138] sm:$0xff]  ;;  %v1206_v39 = vpack.c.bf16 %v343_v32, %v335_v31  ;;  %v398_v32 = vld [vmem:[%s1907_s18 + $0x310] sm:$0xff] }
  0xe1   : > { %1313 = vmatpush1.bf16.xpose.msra.mxu0 %v1312_v33  ;;  %v289_v33 = vld [vmem:[#allocation2 + $0xa8] sm:$0xff] }
  0xe2   : > { %1315 = vmatprep.subr.bf16.mxu0 %v1314_v35  ;;  %v347_v35 = vld [vmem:[%s1907_s18 + $0x178] sm:$0xff] }
  0xe3   : > { %v1334_v41 = vpack.c.bf16 %v347_v35, %v339_v34  ;;  %v402_v34 = vld [vmem:[%s1907_s18 + $0x330] sm:$0xff] }
  0xe4   : > { %v410_v35 = vld [vmem:[%s1907_s18 + $0x370] sm:$0xff] }
  0xe7   : > { %1189 = vmatpush1.bf16.xpose.msra.mxu1 %v1188_v44  ;;  %v293_v44 = vld [vmem:[#allocation2 + $0xc8] sm:$0xff] }
  0xe8   : > { %1191 = vmatprep.subr.bf16.mxu1 %v1190_v46  ;;  %v297_v46 = vld [vmem:[#allocation2 + $0xe8] sm:$0xff] }
  0xe9   : > { %1317 = vmatpush1.bf16.xpose.msra.mxu0 %v1316_v45  ;;  %v338_v45 = vld [vmem:[%s1907_s18 + $0x130] sm:$0xff] }
  0xea   : > { %1319 = vmatprep.subr.bf16.mxu0 %v1318_v47  ;;  %v292_v47 = vld [vmem:[#allocation2 + $0xc0] sm:$0xff] }
  0xef   : > { %1193 = vmatpush1.bf16.xpose.msra.mxu1 %v1192_v56  ;;  %v1208_v56 = vpack.c.bf16 %v342_v43, %v334_v42 }
  0xf0   : > { %1195 = vmatprep.subr.bf16.mxu1 %v1194_v58  ;;  %v1210_v58 = vpack.c.bf16 %v359_v52, %v351_v51  ;;  %v443_v51 = vld [vmem:[%s1907_s18 + $0x478] sm:$0xff] }
  0xf1   : > { %1321 = vmatpush1.bf16.xpose.msra.mxu0 %v1320_v57  ;;  %v1336_v57 = vpack.c.bf16 %v346_v48, %v338_v45  ;;  %v422_v45 = vld [vmem:[%s1907_s18 + $0x3d0] sm:$0xff]  ;;  %v431_v48 = vld [vmem:[%s1907_s18 + $0x418] sm:$0xff] }
  0xf2   : > { %1323 = vmatprep.subr.bf16.mxu0 %v1322_v59  ;;  %v1338_v59 = vpack.c.bf16 %v363_v55, %v355_v54 }
  0xf7   : > { %1197 = vmatpush1.bf16.xpose.msra.mxu1 %v1196_v4  ;;  %v1212_v4 = vpack.c.bf16 %v358_v61, %v350_v60  ;;  %v447_v60 = vld [vmem:[%s1907_s18 + $0x498] sm:$0xff] }
  0xf8   : > { %1199 = vmatprep.subr.bf16.mxu1 %v1198_v6  ;;  %v1214_v6 = vpack.c.bf16 %v375_v1, %v367_v0  ;;  %v455_v61 = vld [vmem:[%s1907_s18 + $0x4d8] sm:$0xff] }
  0xf9   : > { %1325 = vmatpush1.bf16.xpose.msra.mxu0 %v1324_v5  ;;  %v1340_v5 = vpack.c.bf16 %v362_v63, %v354_v62  ;;  %v451_v62 = vld [vmem:[%s1907_s18 + $0x4b8] sm:$0xff] }
  0xfa   : > { %1327 = vmatprep.subr.bf16.mxu0 %v1326_v7  ;;  %v1342_v7 = vpack.c.bf16 %v379_v3, %v371_v2  ;;  %v459_v63 = vld [vmem:[%s1907_s18 + $0x4f8] sm:$0xff]  ;;  %v1234_v2 = vpack.c.bf16 %v455_v61, %v447_v60 }
  0xfb   : > { %v1362_v3 = vpack.c.bf16 %v459_v63, %v451_v62 }
  0xfe   : > { %621 = vmatmul.mubr.f32.vlgmr.msra.gmra.mrb[0].mxu1 %v268_v16  ;;  %v1216_v16 = vpack.c.bf16 %v374_v9, %v366_v8  ;;  %v463_v8 = vld [vmem:[%s1907_s18 + $0x518] sm:$0xff] }
  0xff   : > { %1201 = vmatpush1.bf16.xpose.msra.mxu1 %v1200_v17  ;;  %626 = vmatprep.mubr.f32.mxu1 %v277_v24  ;;  %v1344_v17 = vpack.c.bf16 %v378_v11, %v370_v10  ;;  %v399_v24 = vld [vmem:[%s1907_s18 + $0x318] sm:$0xff] }
 0x100   : > { %799 = vmatmul.mubr.f32.vlgmr.msra.gmra.mrb[0].mxu0 %v272_v18  ;;  %1203 = vmatprep.subr.bf16.mxu1 %v1202_v20  ;;  %v1218_v18 = vpack.c.bf16 %v391_v13, %v383_v12  ;;  %v382_v20 = vld [vmem:[%s1907_s18 + $0x290] sm:$0xff]  ;;  %v471_v9 = vld [vmem:[%s1907_s18 + $0x558] sm:$0xff] }
 0x101   : > { %1329 = vmatpush1.bf16.xpose.msra.mxu0 %v1328_v19  ;;  %804 = vmatprep.mubr.f32.mxu0 %v281_v26  ;;  %v1346_v19 = vpack.c.bf16 %v395_v15, %v387_v14  ;;  %v403_v26 = vld [vmem:[%s1907_s18 + $0x338] sm:$0xff]  ;;  %v1238_v14 = vpack.c.bf16 %v471_v9, %v463_v8 }
 0x102   : > { %1331 = vmatprep.subr.bf16.mxu0 %v1330_v21  ;;  %627 = vmatmul.mubr.f32.gmra.mrb[2].mxu1 %v276_v27  ;;  %v390_v21 = vld [vmem:[%s1907_s18 + $0x2d0] sm:$0xff]  ;;  %v411_v27 = vld [vmem:[%s1907_s18 + $0x378] sm:$0xff] }
 0x103   : > { %632 = vmatprep.mubr.f32.mxu1 %v285_v30  ;;  %v1220_v28 = vpack.c.bf16 %v390_v21, %v382_v20  ;;  %v1222_v30 = vpack.c.bf16 %v407_v25, %v399_v24  ;;  %v1350_v31 = vpack.c.bf16 %v411_v27, %v403_v26  ;;  %v467_v10 = vld [vmem:[%s1907_s18 + $0x538] sm:$0xff] }
 0x104   : > { %805 = vmatmul.mubr.f32.gmra.mrb[2].mxu0 %v280_v29  ;;  %v1348_v29 = vpack.c.bf16 %v394_v23, %v386_v22  ;;  %v475_v11 = vld [vmem:[%s1907_s18 + $0x578] sm:$0xff] }
 0x105   : > { %810 = vmatprep.mubr.f32.mxu0 %v289_v33  ;;  %v406_v33 = vld [vmem:[%s1907_s18 + $0x350] sm:$0xff]  ;;  %v1366_v15 = vpack.c.bf16 %v475_v11, %v467_v10  ;;  %v479_v20 = vld [vmem:[%s1907_s18 + $0x598] sm:$0xff] }
 0x106   : > { %633 = vmatmul.mubr.f32.gmra.mrb[4].mxu1 %v284_v37  ;;  %v423_v37 = vld [vmem:[%s1907_s18 + $0x3d8] sm:$0xff] }
 0x107   : > { %1205 = vmatpush1.bf16.xpose.msra.mxu1 %v1204_v36  ;;  %638 = vmatprep.mubr.f32.mxu1 %v293_v44  ;;  %v415_v36 = vld [vmem:[%s1907_s18 + $0x398] sm:$0xff]  ;;  %v414_v44 = vld [vmem:[%s1907_s18 + $0x390] sm:$0xff] }
 0x108   : > { %811 = vmatmul.mubr.f32.gmra.mrb[4].mxu0 %v288_v40  ;;  %1207 = vmatprep.subr.bf16.mxu1 %v1206_v39  ;;  %v427_v39 = vld [vmem:[%s1907_s18 + $0x3f8] sm:$0xff]  ;;  %v1224_v40 = vpack.c.bf16 %v406_v33, %v398_v32  ;;  %v1226_v42 = vpack.c.bf16 %v423_v37, %v415_v36  ;;  %v1228_v52 = vpack.c.bf16 %v422_v45, %v414_v44 }
 0x109   : > { %1333 = vmatpush1.bf16.xpose.msra.mxu0 %v1332_v38  ;;  %816 = vmatprep.mubr.f32.mxu0 %v297_v46  ;;  %v419_v38 = vld [vmem:[%s1907_s18 + $0x3b8] sm:$0xff]  ;;  %v418_v46 = vld [vmem:[%s1907_s18 + $0x3b0] sm:$0xff] }
 0x10a   : > { %1335 = vmatprep.subr.bf16.mxu0 %v1334_v41  ;;  %639 = vmatmul.mubr.f32.gmra.mrb[6].mxu1 %v292_v47  ;;  %v1352_v41 = vpack.c.bf16 %v410_v35, %v402_v34  ;;  %v1354_v43 = vpack.c.bf16 %v427_v39, %v419_v38  ;;  %v426_v47 = vld [vmem:[%s1907_s18 + $0x3f0] sm:$0xff]  ;;  %v487_v21 = vld [vmem:[%s1907_s18 + $0x5d8] sm:$0xff] }
 0x10b   : > { %709 = vmatprep.mubr.f32.mxu1 %v271_v50  ;;  %v435_v50 = vld [vmem:[%s1907_s18 + $0x438] sm:$0xff]  ;;  %v1242_v26 = vpack.c.bf16 %v487_v21, %v479_v20 }
 0x10c   : > { %817 = vmatmul.mubr.f32.gmra.mrb[6].mxu0 %v296_v49  ;;  %v439_v49 = vld [vmem:[%s1907_s18 + $0x458] sm:$0xff]  ;;  %v1358_v55 = vpack.c.bf16 %v443_v51, %v435_v50 }
 0x10d   : > { %887 = vmatprep.mubr.f32.mxu0 %v275_v53  ;;  %v1356_v53 = vpack.c.bf16 %v426_v47, %v418_v46  ;;  %v1230_v54 = vpack.c.bf16 %v439_v49, %v431_v48  ;;  %v483_v22 = vld [vmem:[%s1907_s18 + $0x5b8] sm:$0xff] }
 0x10e   : > { %v491_v23 = vld [vmem:[%s1907_s18 + $0x5f8] sm:$0xff] }
 0x10f   : > { %1209 = vmatpush1.bf16.xpose.msra.mxu1 %v1208_v56  ;;  %v430_v56 = vld [vmem:[%s1907_s18 + $0x410] sm:$0xff]  ;;  %v1370_v27 = vpack.c.bf16 %v491_v23, %v483_v22  ;;  %v495_v32 = vld [vmem:[%s1907_s18 + $0x618] sm:$0xff] }
 0x110   : > { %1211 = vmatprep.subr.bf16.mxu1 %v1210_v58  ;;  %v434_v58 = vld [vmem:[%s1907_s18 + $0x430] sm:$0xff]  ;;  %v503_v33 = vld [vmem:[%s1907_s18 + $0x658] sm:$0xff] }
 0x111   : > { %1337 = vmatpush1.bf16.xpose.msra.mxu0 %v1336_v57  ;;  %v438_v57 = vld [vmem:[%s1907_s18 + $0x450] sm:$0xff]  ;;  %v499_v34 = vld [vmem:[%s1907_s18 + $0x638] sm:$0xff]  ;;  %v1246_v38 = vpack.c.bf16 %v503_v33, %v495_v32  ;;  %v923_v32 = vlaneseq }
 0x112   : > { %1339 = vmatprep.subr.bf16.mxu0 %v1338_v59  ;;  %v442_v59 = vld [vmem:[%s1907_s18 + $0x470] sm:$0xff]  ;;  %v1232_v0 = vpack.c.bf16 %v438_v57, %v430_v56  ;;  %v507_v35 = vld [vmem:[%s1907_s18 + $0x678] sm:$0xff] }
 0x113   : > { %v1360_v1 = vpack.c.bf16 %v442_v59, %v434_v58  ;;  %v1374_v39 = vpack.c.bf16 %v507_v35, %v499_v34  ;;  %v511_v44 = vld [vmem:[%s1907_s18 + $0x698] sm:$0xff]  ;;  %v278_v22 = vld [vmem:[#allocation2 + $0x50] sm:$0xff]  ;;  %v924_v33 = vshrl.u32 %v923_v32, 7  ;;  %v920_v34 = vld [vmem:[%s235_s26] sm:$0x3] }
 0x114   : > { %v519_v45 = vld [vmem:[%s1907_s18 + $0x6d8] sm:$0xff]  ;;  %v282_v23 = vld [vmem:[#allocation2 + $0x70] sm:$0xff]  ;;  %v921_v35 = vmul.f32 0.01, %v920_v34 }
 0x115   : > { %v515_v46 = vld [vmem:[%s1907_s18 + $0x6b8] sm:$0xff]  ;;  %v1250_v50 = vpack.c.bf16 %v519_v45, %v511_v44 }
 0x116   : > { %v523_v47 = vld [vmem:[%s1907_s18 + $0x6f8] sm:$0xff] }
 0x117   : > { %1213 = vmatpush1.bf16.xpose.msra.mxu1 %v1212_v4  ;;  %v446_v4 = vld [vmem:[%s1907_s18 + $0x490] sm:$0xff]  ;;  %v1378_v51 = vpack.c.bf16 %v523_v47, %v515_v46  ;;  %v527_v56 = vld [vmem:[%s1907_s18 + $0x718] sm:$0xff] }
 0x118   : > { %1215 = vmatprep.subr.bf16.mxu1 %v1214_v6  ;;  %v450_v6 = vld [vmem:[%s1907_s18 + $0x4b0] sm:$0xff]  ;;  %v535_v57 = vld [vmem:[%s1907_s18 + $0x758] sm:$0xff] }
 0x119   : > { %1341 = vmatpush1.bf16.xpose.msra.mxu0 %v1340_v5  ;;  %v454_v5 = vld [vmem:[%s1907_s18 + $0x4d0] sm:$0xff]  ;;  %v531_v58 = vld [vmem:[%s1907_s18 + $0x738] sm:$0xff]  ;;  %v1254_v62 = vpack.c.bf16 %v535_v57, %v527_v56 }
 0x11a   : > { %1343 = vmatprep.subr.bf16.mxu0 %v1342_v7  ;;  %v458_v7 = vld [vmem:[%s1907_s18 + $0x4f0] sm:$0xff]  ;;  %v1236_v12 = vpack.c.bf16 %v454_v5, %v446_v4  ;;  %v539_v59 = vld [vmem:[%s1907_s18 + $0x778] sm:$0xff] }
 0x11b   : > { %v1364_v13 = vpack.c.bf16 %v458_v7, %v450_v6  ;;  %v1382_v63 = vpack.c.bf16 %v539_v59, %v531_v58  ;;  %v543_v4 = vld [vmem:[%s1907_s18 + $0x798] sm:$0xff]  ;;  %v1679_v58 = vmov 0.28284273  }
 0x11c   : > { %v551_v5 = vld [vmem:[%s1907_s18 + $0x7d8] sm:$0xff] }
 0x11d   : > { %v547_v6 = vld [vmem:[%s1907_s18 + $0x7b8] sm:$0xff]  ;;  %v1258_v10 = vpack.c.bf16 %v551_v5, %v543_v4 }
 0x11e   : > { %v555_v7 = vld [vmem:[%s1907_s18 + $0x7f8] sm:$0xff] }
 0x11f   : > { %1217 = vmatpush1.bf16.xpose.msra.mxu1 %v1216_v16  ;;  %v462_v16 = vld [vmem:[%s1907_s18 + $0x510] sm:$0xff]  ;;  %v1386_v11 = vpack.c.bf16 %v555_v7, %v547_v6  ;;  %v279_v20 = vld [vmem:[#allocation2 + $0x58] sm:$0xff] }
 0x120   : > { %1219 = vmatprep.subr.bf16.mxu1 %v1218_v18  ;;  %v466_v18 = vld [vmem:[%s1907_s18 + $0x530] sm:$0xff]  ;;  %v283_v21 = vld [vmem:[#allocation2 + $0x78] sm:$0xff] }
 0x121   : > { %1345 = vmatpush1.bf16.xpose.msra.mxu0 %v1344_v17  ;;  %v470_v17 = vld [vmem:[%s1907_s18 + $0x550] sm:$0xff] }
 0x122   : > { %1347 = vmatprep.subr.bf16.mxu0 %v1346_v19  ;;  %v474_v19 = vld [vmem:[%s1907_s18 + $0x570] sm:$0xff]  ;;  %v1240_v24 = vpack.c.bf16 %v470_v17, %v462_v16 }
 0x123   : > { %v1368_v25 = vpack.c.bf16 %v474_v19, %v466_v18  ;;  %v270_v18 = vld [vmem:[#allocation2 + $0x10] sm:$0xff] }
 0x124   : > { %v274_v19 = vld [vmem:[#allocation2 + $0x30] sm:$0xff] }
 0x127   : > { %1221 = vmatpush1.bf16.xpose.msra.mxu1 %v1220_v28  ;;  %v478_v28 = vld [vmem:[%s1907_s18 + $0x590] sm:$0xff] }
 0x128   : > { %1223 = vmatprep.subr.bf16.mxu1 %v1222_v30  ;;  %v482_v30 = vld [vmem:[%s1907_s18 + $0x5b0] sm:$0xff] }
 0x129   : > { %1349 = vmatpush1.bf16.xpose.msra.mxu0 %v1348_v29  ;;  %v486_v29 = vld [vmem:[%s1907_s18 + $0x5d0] sm:$0xff] }
 0x12a   : > { %1351 = vmatprep.subr.bf16.mxu0 %v1350_v31  ;;  %v490_v31 = vld [vmem:[%s1907_s18 + $0x5f0] sm:$0xff]  ;;  %v1244_v36 = vpack.c.bf16 %v486_v29, %v478_v28  ;;  %v295_v28 = vld [vmem:[#allocation2 + $0xd8] sm:$0xff] }
 0x12b   : > { %v1372_v37 = vpack.c.bf16 %v490_v31, %v482_v30  ;;  %v299_v29 = vld [vmem:[#allocation2 + $0xf8] sm:$0xff]  ;;  %v294_v30 = vld [vmem:[#allocation2 + $0xd0] sm:$0xff] }
 0x12c   : > { %v298_v31 = vld [vmem:[#allocation2 + $0xf0] sm:$0xff] }
 0x12f   : > { %1225 = vmatpush1.bf16.xpose.msra.mxu1 %v1224_v40  ;;  %v494_v40 = vld [vmem:[%s1907_s18 + $0x610] sm:$0xff] }
 0x130   : > { %1227 = vmatprep.subr.bf16.mxu1 %v1226_v42  ;;  %v498_v42 = vld [vmem:[%s1907_s18 + $0x630] sm:$0xff] }
 0x131   : > { %1353 = vmatpush1.bf16.xpose.msra.mxu0 %v1352_v41  ;;  %v502_v41 = vld [vmem:[%s1907_s18 + $0x650] sm:$0xff] }
 0x132   : > { %1355 = vmatprep.subr.bf16.mxu0 %v1354_v43  ;;  %v506_v43 = vld [vmem:[%s1907_s18 + $0x670] sm:$0xff]  ;;  %v1248_v48 = vpack.c.bf16 %v502_v41, %v494_v40 }
 0x133   : > { %v1376_v49 = vpack.c.bf16 %v506_v43, %v498_v42 }
 0x137   : > { %1229 = vmatpush1.bf16.xpose.msra.mxu1 %v1228_v52  ;;  %v510_v52 = vld [vmem:[%s1907_s18 + $0x690] sm:$0xff] }
 0x138   : > { %1231 = vmatprep.subr.bf16.mxu1 %v1230_v54  ;;  %v514_v54 = vld [vmem:[%s1907_s18 + $0x6b0] sm:$0xff] }
 0x139   : > { %1357 = vmatpush1.bf16.xpose.msra.mxu0 %v1356_v53  ;;  %v518_v53 = vld [vmem:[%s1907_s18 + $0x6d0] sm:$0xff] }
 0x13a   : > { %1359 = vmatprep.subr.bf16.mxu0 %v1358_v55  ;;  %v522_v55 = vld [vmem:[%s1907_s18 + $0x6f0] sm:$0xff]  ;;  %v1252_v60 = vpack.c.bf16 %v518_v53, %v510_v52 }
 0x13b   : > { %v1380_v61 = vpack.c.bf16 %v522_v55, %v514_v54 }
 0x13f   : > { %1233 = vmatpush1.bf16.xpose.msra.mxu1 %v1232_v0  ;;  %v526_v0 = vld [vmem:[%s1907_s18 + $0x710] sm:$0xff] }
 0x140   : > { %1235 = vmatprep.subr.bf16.mxu1 %v1234_v2  ;;  %v530_v2 = vld [vmem:[%s1907_s18 + $0x730] sm:$0xff] }
 0x141   : > { %1361 = vmatpush1.bf16.xpose.msra.mxu0 %v1360_v1  ;;  %v534_v1 = vld [vmem:[%s1907_s18 + $0x750] sm:$0xff] }
 0x142   : > { %1363 = vmatprep.subr.bf16.mxu0 %v1362_v3  ;;  %v538_v3 = vld [vmem:[%s1907_s18 + $0x770] sm:$0xff]  ;;  %v1256_v8 = vpack.c.bf16 %v534_v1, %v526_v0 }
 0x143   : > { %v1384_v9 = vpack.c.bf16 %v538_v3, %v530_v2 }
 0x147   : > { %1237 = vmatpush1.bf16.xpose.msra.mxu1 %v1236_v12  ;;  %v542_v12 = vld [vmem:[%s1907_s18 + $0x790] sm:$0xff] }
 0x148   : > { %1239 = vmatprep.subr.bf16.mxu1 %v1238_v14  ;;  %v546_v14 = vld [vmem:[%s1907_s18 + $0x7b0] sm:$0xff] }
 0x149   : > { %1365 = vmatpush1.bf16.xpose.msra.mxu0 %v1364_v13  ;;  %v550_v13 = vld [vmem:[%s1907_s18 + $0x7d0] sm:$0xff] }
 0x14a   : > { %1367 = vmatprep.subr.bf16.mxu0 %v1366_v15  ;;  %v554_v15 = vld [vmem:[%s1907_s18 + $0x7f0] sm:$0xff]  ;;  %v1260_v16 = vpack.c.bf16 %v550_v13, %v542_v12 }
 0x14b   : > { %v1388_v17 = vpack.c.bf16 %v554_v15, %v546_v14 }
 0x14f   : > { %1241 = vmatpush1.bf16.xpose.msra.mxu1 %v1240_v24  ;;  %v287_v24 = vld [vmem:[#allocation2 + $0x98] sm:$0xff] }
 0x150   : > { %1243 = vmatprep.subr.bf16.mxu1 %v1242_v26  ;;  %v286_v26 = vld [vmem:[#allocation2 + $0x90] sm:$0xff] }
 0x151   : > { %1369 = vmatpush1.bf16.xpose.msra.mxu0 %v1368_v25  ;;  %v291_v25 = vld [vmem:[#allocation2 + $0xb8] sm:$0xff] }
 0x152   : > { %1371 = vmatprep.subr.bf16.mxu0 %v1370_v27  ;;  %v290_v27 = vld [vmem:[#allocation2 + $0xb0] sm:$0xff] }
 0x157   : > { %1245 = vmatpush1.bf16.xpose.msra.mxu1 %v1244_v36  ;;  %v925_v36 = vsub.s32 0, %v924_v33 }
 0x158   : > { %1247 = vmatprep.subr.bf16.mxu1 %v1246_v38 }
 0x159   : > { %1373 = vmatpush1.bf16.xpose.msra.mxu0 %v1372_v37  ;;  %v929_v37 = vsub.s32 1, %v924_v33  ;;  %v926_v42 = vrot.slane %v921_v35, %v925_v36 }
 0x15a   : > { %1375 = vmatprep.subr.bf16.mxu0 %v1374_v39 }
 0x15b   : > { %v930_v45 = vrot.slane %v921_v35, %v929_v37 }
 0x15f   : > { %1249 = vmatpush1.bf16.xpose.msra.mxu1 %v1248_v48 }
 0x160   : > { %1251 = vmatprep.subr.bf16.mxu1 %v1250_v50 }
 0x161   : > { %1377 = vmatpush1.bf16.xpose.msra.mxu0 %v1376_v49 }
 0x162   : > { %1379 = vmatprep.subr.bf16.mxu0 %v1378_v51 }
 0x167   : > { %1253 = vmatpush1.bf16.xpose.msra.mxu1 %v1252_v60 }
 0x168   : > { %1255 = vmatprep.subr.bf16.mxu1 %v1254_v62 }
 0x169   : > { %1381 = vmatpush1.bf16.xpose.msra.mxu0 %v1380_v61 }
 0x16a   : > { %1383 = vmatprep.subr.bf16.mxu0 %v1382_v63 }
 0x16f   : > { %1257 = vmatpush1.bf16.xpose.msra.mxu1 %v1256_v8 }
 0x170   : > { %1259 = vmatprep.subr.bf16.mxu1 %v1258_v10 }
 0x171   : > { %1385 = vmatpush1.bf16.xpose.msra.mxu0 %v1384_v9 }
 0x172   : > { %1387 = vmatprep.subr.bf16.mxu0 %v1386_v11 }
 0x177   : > { %1261 = vmatpush1.bf16.xpose.msra.mxu1 %v1260_v16 }
 0x179   : > { %1389 = vmatpush1.bf16.xpose.msra.mxu0 %v1388_v17 }
 0x17e   : > { %710 = vmatmul.mubr.f32.vlgmr.msra.gmra.mrb[0].mxu1 %v270_v18 }
 0x17f   : > { %715 = vmatprep.mubr.f32.mxu1 %v279_v20 }
 0x180   : > { %888 = vmatmul.mubr.f32.vlgmr.msra.gmra.mrb[0].mxu0 %v274_v19 }
 0x181   : > { %893 = vmatprep.mubr.f32.mxu0 %v283_v21 }
 0x182   : > { %716 = vmatmul.mubr.f32.gmra.mrb[2].mxu1 %v278_v22 }
 0x183   : > { %721 = vmatprep.mubr.f32.mxu1 %v287_v24 }
 0x184   : > { %894 = vmatmul.mubr.f32.gmra.mrb[2].mxu0 %v282_v23 }
 0x185   : > { %899 = vmatprep.mubr.f32.mxu0 %v291_v25 }
 0x186   : > { %722 = vmatmul.mubr.f32.gmra.mrb[4].mxu1 %v286_v26 }
 0x187   : > { %727 = vmatprep.mubr.f32.mxu1 %v295_v28 }
 0x188   : > { %900 = vmatmul.mubr.f32.gmra.mrb[4].mxu0 %v290_v27 }
 0x189   : > { %905 = vmatprep.mubr.f32.mxu0 %v299_v29 }
 0x18a   : > { %728 = vmatmul.mubr.f32.gmra.mrb[6].mxu1 %v294_v30 }
 0x18c   : > { %906 = vmatmul.mubr.f32.gmra.mrb[6].mxu0 %v298_v31 }
 0x251   : > { %v711_v38 = vpop.f32.mrb[0].mxu1 }
 0x252   : > { %v713_v40 = vpop.f32.mrb[1].mxu1 }
 0x253   : > { %v889_v39 = vpop.f32.mrb[0].mxu0 }
 0x254   : > { %v1390_v41 = vadd.f32 %v889_v39, %v711_v38  ;;  %v891_v43 = vpop.f32.mrb[1].mxu0 }
 0x255   : > { %v1391_v44 = vadd.f32 %v891_v43, %v713_v40  ;;  %v717_v47 = vpop.f32.mrb[2].mxu1 }
 0x256   : > { %v912_v46 = vmul.f32 0.0003125, %v1390_v41  ;;  %v719_v50 = vpop.f32.mrb[3].mxu1 }
 0x257   : > { %v913_v48 = vmul.f32 0.0003125, %v1391_v44  ;;  %v895_v49 = vpop.f32.mrb[2].mxu0 }
 0x258   : > { %v933_v51 = vadd.f32 %v926_v42, %v912_v46  ;;  %v1392_v52 = vadd.f32 %v895_v49, %v717_v47  ;;  %v897_v53 = vpop.f32.mrb[3].mxu0 }
 0x259   : > { %v934_v54 = vadd.f32 %v930_v45, %v913_v48  ;;  %v1393_v55 = vadd.f32 %v897_v53, %v719_v50  ;;  %v723_v57 = vpop.f32.mrb[4].mxu1 }
 0x25a   : > { %vm941_vm0 = vcmp.ge.f32.partialorder %v933_v51, 0.0  ;;  %v914_v56 = vmul.f32 0.0003125, %v1392_v52  ;;  %v725_v2 = vpop.f32.mrb[5].mxu1 }
 0x25b   : > { %v949_v59 = vsel %vm941_vm0, 1.4142135, %v1679_v58  ;;  %vm942_vm1 = vcmp.ge.f32.partialorder %v934_v54, 0.0  ;;  %v915_v60 = vmul.f32 0.0003125, %v1393_v55  ;;  %v901_v61 = vpop.f32.mrb[4].mxu0 }
 0x25c   : > { %v957_v62 = vmul.f32 %v949_v59, %v933_v51  ;;  %v950_v63 = vsel %vm942_vm1, 1.4142135, %v1679_v58  ;;  %v935_v0 = vadd.f32 %v926_v42, %v914_v56  ;;  %v1394_v1 = vadd.f32 %v901_v61, %v723_v57  ;;  %v903_v3 = vpop.f32.mrb[5].mxu0 }
 0x25d   : > { %v958_v4 = vmul.f32 %v950_v63, %v934_v54  ;;  %v936_v5 = vadd.f32 %v930_v45, %v915_v60  ;;  %v1395_v6 = vadd.f32 %v903_v3, %v725_v2  ;;  %v729_v8 = vpop.f32.mrb[6].mxu1 }
 0x25e   : > { %965 = vst [vmem:[%s2171_s7] sm:$0xff] %v957_v62  ;;  %vm943_vm2 = vcmp.ge.f32.partialorder %v935_v0, 0.0  ;;  %v916_v7 = vmul.f32 0.0003125, %v1394_v1  ;;  %v731_v16 = vpop.f32.mrb[7].mxu1 }
 0x25f   : > { %966 = vst [vmem:[%s2171_s7 + $0x8] sm:$0xff] %v958_v4  ;;  %v951_v9 = vsel %vm943_vm2, 1.4142135, %v1679_v58  ;;  %vm944_vm3 = vcmp.ge.f32.partialorder %v936_v5, 0.0  ;;  %v917_v10 = vmul.f32 0.0003125, %v1395_v6 }
 0x260   : > { %v907_v11 = vpop.f32.mrb[6].mxu0  ;;  %v959_v12 = vmul.f32 %v951_v9, %v935_v0  ;;  %v952_v13 = vsel %vm944_vm3, 1.4142135, %v1679_v58  ;;  %v937_v14 = vadd.f32 %v926_v42, %v916_v7 }
 0x261   : > { %v1396_v15 = vadd.f32 %v907_v11, %v729_v8  ;;  %v909_v17 = vpop.f32.mrb[7].mxu0  ;;  %v960_v18 = vmul.f32 %v952_v13, %v936_v5  ;;  %v938_v19 = vadd.f32 %v930_v45, %v917_v10 }
 0x262   : > { %v1397_v20 = vadd.f32 %v909_v17, %v731_v16  ;;  %967 = vst [vmem:[%s2171_s7 + $0x10] sm:$0xff] %v959_v12  ;;  %vm945_vm4 = vcmp.ge.f32.partialorder %v937_v14, 0.0 }
 0x263   : > { %v918_v21 = vmul.f32 0.0003125, %v1396_v15  ;;  %968 = vst [vmem:[%s2171_s7 + $0x18] sm:$0xff] %v960_v18  ;;  %v953_v22 = vsel %vm945_vm4, 1.4142135, %v1679_v58  ;;  %vm946_vm5 = vcmp.ge.f32.partialorder %v938_v19, 0.0 }
 0x264   : > { %v919_v23 = vmul.f32 0.0003125, %v1397_v20  ;;  %v961_v24 = vmul.f32 %v953_v22, %v937_v14  ;;  %v954_v25 = vsel %vm946_vm5, 1.4142135, %v1679_v58 }
 0x265   : > { %v939_v26 = vadd.f32 %v926_v42, %v918_v21  ;;  %v962_v27 = vmul.f32 %v954_v25, %v938_v19 }
 0x266   : > { %v940_v28 = vadd.f32 %v930_v45, %v919_v23  ;;  %969 = vst [vmem:[%s2171_s7 + $0x20] sm:$0xff] %v961_v24 }
 0x267   : > { %vm947_vm6 = vcmp.ge.f32.partialorder %v939_v26, 0.0  ;;  %970 = vst [vmem:[%s2171_s7 + $0x28] sm:$0xff] %v962_v27 }
 0x268   : > { %v955_v29 = vsel %vm947_vm6, 1.4142135, %v1679_v58  ;;  %vm948_vm7 = vcmp.ge.f32.partialorder %v940_v28, 0.0 }
 0x269   : > { %v963_v30 = vmul.f32 %v955_v29, %v939_v26  ;;  %v956_v31 = vsel %vm948_vm7, 1.4142135, %v1679_v58 }
 0x26a   : > { %v964_v32 = vmul.f32 %v956_v31, %v940_v28 }
 0x26b   : > { %971 = vst [vmem:[%s2171_s7 + $0x30] sm:$0xff] %v963_v30 }
 0x26c   : > { %972 = vst [vmem:[%s2171_s7 + $0x38] sm:$0xff] %v964_v32 }
 0x26d   : > { %1599 = shalt.err (!%p1596_p8)
}
 0x26e   : > { %s1600_s30 = scalar_lea.hbm %s2186_s11, 1024  ;;  %s1604_s1 = scalar_lea.hbm %s2240_s3, 2048 }
 0x26f   : > { %p1601_p10 = scmp.ne.s32.totalorder %s2186_s11, %s1600_s30  ;;  %p1605_p4 = scmp.lt.u32.totalorder %s2186_s11, %s2240_s3 }
 0x270   : > { %p1606_p2 = scmp.lt.u32.totalorder %s1604_s1, %s1600_s30  ;;  %p1608_p3 = scmp.lt.u32.totalorder %s1600_s30, %s2186_s11 }
 0x271   : > { %p1602_p13 = pnand %p1601_p10, %p2270_p5 }
 0x272   : > { %p1607_p11 = por %p1606_p2, %p1605_p4 }
 0x273   : > { %p1603_p7 = pneg %p1602_p13 }
 0x274   : > { %p1609_p1 = por %p1608_p3, %p1607_p11 }
 0x276   : > { %p1610_p12 = pnand %p1609_p1, %p1603_p7 }
 0x278   : > { %1613 = shalt.err (!%p1610_p12)
}
 0x279   : > { %s1681_s26 = smov 256   ;;  %s1682_s28 = smov 512  }
 0x27a   : > { %s1683_s7 = smov 16  }
 0x27b   : > { %1422 = dma.vmem_to_hbm [thread:$0]  (%p2270_p5), %s2180_s8, 1024, %s2186_s11, %s974_s15, %s1681_s26, %s1682_s28, %s1683_s7  }
 0x27c PF: > { %s1005_s21 = sand.u32 1, %s1652_s12   ;;  %p2271_p0 = scmp.ne.s32.totalorder %s2258_s4, 0 }
 0x27d   : > { %p2272_p9 = scmp.ge.s32.totalorder %s1672_s17, 2  ;;  %s1006_s27 = scalar_lea.sflag [#allocation4], %s1005_s21 }
 0x27f   : > { %p1436_p6 = pnand %p2272_p9, %p2271_p0 }
 0x281   : > { %1647 = dma.done.wait (!%p1436_p6), %s1006_s27, 1024  }
 0x282   : > { %1649 = vsyncadd (!%p1436_p6), %s1006_s27, 4294966272  ;;  %s20_s17 = sadd.s32 1, %s1672_s17   ;;  %s2273_s29 = sld [smem:[#allocation12_spill]] }
 0x283   : > { %p17_p8 = scmp.ge.s32.totalorder %s20_s17, 4   ;;  %s2274_s12 = smov %s1656_s13 }
 0x284   : > { %s2275_s13 = smov %s1660_s14  ;;  %s2276_s14 = smov %s1755_s24 }
 0x285   : > { %s2277_s15 = smov %s1668_s16  ;;  %19 = sbr.rel (!%p17_p8) target bundleno = 9 (0x9), region = 94 }
 0x288   : > { %s2278_s16 = smov %s2273_s29 }
 0x28c   :  { %1011 = vsyncpa [#allocation3], 1 }
 0x28d   :  { %1013 = vsyncpa [#allocation3 + $0x1], 1 }
 0x28e   :  { %1014 = vsyncpa [#allocation6], 1 }
 0x28f   :  { %1016 = vsyncpa [#allocation6 + $0x1], 1 }
 0x290   :  { %1017 = vsyncpa [#allocation4], 1 }
 0x291   :  { %1019 = vsyncpa [#allocation4 + $0x1], 1 }

</bundles_post_ra>
